<compile_context>
chip_gen: v7x
topology: tpu7x:2x2x1
jax: 0.10.0
libtpu: 0.0.40
codegen_flags: <defaults>
</compile_context>

<pallas_src>
import functools

import numpy as np
import jax
import jax.numpy as jnp
from jax import lax
from jax.experimental import pallas as pl
from jax.experimental.pallas import tpu as pltpu


def _encoder_layer_kernel(nhead, eps, has_pos, *refs):
    if has_pos:
        (src_ref, pos_ref, wq_ref, wk_ref, wv_ref, bq_ref, bk_ref, bv_ref,
         wo_ref, w1_ref, b1_ref, w2_ref, vec_ref, out_ref, ctx_ref) = refs
    else:
        (src_ref, wq_ref, wk_ref, wv_ref, bq_ref, bk_ref, bv_ref,
         wo_ref, w1_ref, b1_ref, w2_ref, vec_ref, out_ref, ctx_ref) = refs

    x = src_ref[0].astype(jnp.float32)                   # (S, D)  value = src
    if has_pos:
        xp = x + pos_ref[0].astype(jnp.float32)          # (S, D)  q = k = src + pos
    else:
        xp = x
    S, D = x.shape
    Dh = D // nhead

    xb = x.astype(jnp.bfloat16)       # value path, bf16 MXU operand
    xpb = xp.astype(jnp.bfloat16)     # query/key path, bf16 MXU operand

    # ---- per-head attention; weights are head-major slabs (full-D contraction) ----
    for h in range(nhead):            # static loop, nhead is small
        q_h = jnp.dot(xpb, wq_ref[h], preferred_element_type=jnp.float32) + bq_ref[h]
        k_h = jnp.dot(xpb, wk_ref[h], preferred_element_type=jnp.float32) + bk_ref[h]
        v_h = jnp.dot(xb,  wv_ref[h], preferred_element_type=jnp.float32) + bv_ref[h]

        logits = jnp.einsum('qd,kd->qk',
                            q_h.astype(jnp.bfloat16), k_h.astype(jnp.bfloat16),
                            preferred_element_type=jnp.float32)         # (S, S) f32
        m = jnp.max(logits, axis=-1, keepdims=True)
        p = jnp.exp(logits - m)
        denom = jnp.sum(p, axis=-1, keepdims=True)
        p = p * pl.reciprocal(denom, approx=True)                        # EUP slot

        ctx_h = jnp.dot(p.astype(jnp.bfloat16), v_h.astype(jnp.bfloat16),
                        preferred_element_type=jnp.float32)              # (S, Dh)
        ctx_ref[:, h * Dh:(h + 1) * Dh] = ctx_h                          # head concat

    # ---- packed bias / LayerNorm vectors: [bo, g1, be1, b2, g2, be2] ----
    bo = vec_ref[0:1, :]
    g1 = vec_ref[1:2, :]
    be1 = vec_ref[2:3, :]
    b2 = vec_ref[3:4, :]
    g2 = vec_ref[4:5, :]
    be2 = vec_ref[5:6, :]

    # ---- single full-D-contraction output projection ----
    attn = jnp.dot(ctx_ref[...].astype(jnp.bfloat16), wo_ref[...],
                   preferred_element_type=jnp.float32) + bo

    # ---- residual + LayerNorm1 (f32 elementwise) ----
    y = x + attn
    mu = jnp.mean(y, axis=-1, keepdims=True)
    var = jnp.mean((y - mu) * (y - mu), axis=-1, keepdims=True)
    y = (y - mu) * lax.rsqrt(var + eps) * g1 + be1

    # ---- feed-forward: Linear1 + ReLU + Linear2 (dropout = identity, eval) ----
    h1 = jnp.dot(y.astype(jnp.bfloat16), w1_ref[...],
                 preferred_element_type=jnp.float32) + b1_ref[...]
    h1 = jnp.maximum(h1, 0.0)
    f = jnp.dot(h1.astype(jnp.bfloat16), w2_ref[...],
                preferred_element_type=jnp.float32) + b2

    # ---- residual + LayerNorm2 ----
    z = y + f
    mu2 = jnp.mean(z, axis=-1, keepdims=True)
    var2 = jnp.mean((z - mu2) * (z - mu2), axis=-1, keepdims=True)
    z = (z - mu2) * lax.rsqrt(var2 + eps) * g2 + be2

    out_ref[0] = z.astype(out_ref.dtype)


def transformer_encoder_layer(src, pos, params, nhead, eps=1e-5):
    """src, pos: (S, B, D) like PyTorch nn.MultiheadAttention (batch_first=False)."""
    S, B, D = src.shape
    assert D % nhead == 0
    H = nhead
    Dh = D // H
    scaling = float(Dh) ** -0.5
    f32, bf16 = jnp.float32, jnp.bfloat16

    # ---- wrapper-side weight prep (plain JAX, runs once per call) ----
    w_in = params['in_proj_weight'].astype(f32)          # (3D, D)
    b_in = params['in_proj_bias'].astype(f32)            # (3D,)

    def head_major(w):                                   # (D, D) -> (H, D, Dh) slabs
        return jnp.transpose(w.reshape(H, Dh, D), (0, 2, 1))

    wq_hm = (head_major(w_in[:D]) * scaling).astype(bf16)    # q-scaling folded
    wk_hm = head_major(w_in[D:2 * D]).astype(bf16)
    wv_hm = head_major(w_in[2 * D:]).astype(bf16)
    bq = (b_in[:D] * scaling).reshape(H, 1, Dh).astype(f32)
    bk = b_in[D:2 * D].reshape(H, 1, Dh).astype(f32)
    bv = b_in[2 * D:].reshape(H, 1, Dh).astype(f32)

    wo = params['out_proj_weight'].astype(f32).T.astype(bf16)     # (D, D)
    w1 = params['w1'].astype(f32).T.astype(bf16)                  # (D, F)
    w2 = params['w2'].astype(f32).T.astype(bf16)                  # (F, D)
    b1 = params['b1'].astype(f32).reshape(1, -1)                  # (1, F)
    F_ = w1.shape[1]

    vecs = jnp.stack([                                            # packed (6, D)
        params['out_proj_bias'], params['ln1_g'], params['ln1_b'],
        params['b2'], params['ln2_g'], params['ln2_b'],
    ]).astype(f32)

    has_pos = pos is not None
    # TODO(synk): zero-copy (S, B, D) block indexing would drop these transposes.
    x = jnp.transpose(src, (1, 0, 2))                             # (B, S, D)
    ops = [x]
    if has_pos:
        ops.append(jnp.transpose(pos, (1, 0, 2)))

    per_b = lambda b: (b, 0, 0)
    full2 = lambda b: (0, 0)
    full3 = lambda b: (0, 0, 0)

    in_specs = [pl.BlockSpec((1, S, D), per_b)]                   # src
    if has_pos:
        in_specs.append(pl.BlockSpec((1, S, D), per_b))           # pos
    in_specs += [
        pl.BlockSpec((H, D, Dh), full3),      # Wq head-major (scaled), bf16
        pl.BlockSpec((H, D, Dh), full3),      # Wk head-major, bf16
        pl.BlockSpec((H, D, Dh), full3),      # Wv head-major, bf16
        pl.BlockSpec((H, 1, Dh), full3),      # bq (scaled)
        pl.BlockSpec((H, 1, Dh), full3),      # bk
        pl.BlockSpec((H, 1, Dh), full3),      # bv
        pl.BlockSpec((D, D), full2),          # Wo^T, bf16
        pl.BlockSpec((D, F_), full2),         # W1^T, bf16
        pl.BlockSpec((1, F_), full2),         # b1
        pl.BlockSpec((F_, D), full2),         # W2^T, bf16
        pl.BlockSpec((6, D), full2),          # packed [bo, g1, be1, b2, g2, be2]
    ]

    try:
        vmem_cap = pltpu.get_tpu_info().vmem_capacity_bytes
    except Exception:
        vmem_cap = 64 * 1024 * 1024
    vmem_limit = min(int(vmem_cap * 7 // 8), 100 * 1024 * 1024)   # headroom on all gens

    kernel = functools.partial(_encoder_layer_kernel, H, float(eps), has_pos)
    out = pl.pallas_call(
        kernel,
        out_shape=jax.ShapeDtypeStruct((B, S, D), src.dtype),
        grid=(B,),
        in_specs=in_specs,
        out_specs=pl.BlockSpec((1, S, D), per_b),
        scratch_shapes=[pltpu.VMEM((S, D), jnp.float32)],         # head-concat ctx
        compiler_params=pltpu.CompilerParams(
            dimension_semantics=("parallel",),
            vmem_limit_bytes=vmem_limit),
    )(*ops, wq_hm, wk_hm, wv_hm, bq, bk, bv, wo, w1, b1, w2, vecs)

    return jnp.transpose(out, (1, 0, 2))                          # back to (S, B, D)


# ---------------- pure-JAX f32 reference (mirrors PyTorch eval-mode forward) ----------------
def _layernorm(x, g, b, eps):
    mu = jnp.mean(x, axis=-1, keepdims=True)
    var = jnp.mean((x - mu) ** 2, axis=-1, keepdims=True)
    return (x - mu) * lax.rsqrt(var + eps) * g + b


def _reference(src, pos, params, nhead, eps=1e-5):
    S, B, D = src.shape
    H = nhead
    Dh = D // H
    xp = src if pos is None else src + pos
    w_in = params['in_proj_weight']
    b_in = params['in_proj_bias']
    q = xp @ w_in[:D].T + b_in[:D]
    k = xp @ w_in[D:2 * D].T + b_in[D:2 * D]
    v = src @ w_in[2 * D:].T + b_in[2 * D:]
    q = q * (float(Dh) ** -0.5)

    def to_heads(t):
        return t.reshape(S, B, H, Dh).transpose(1, 2, 0, 3)      # (B, H, S, Dh)

    qh, kh, vh = map(to_heads, (q, k, v))
    logits = jnp.einsum('bhqd,bhkd->bhqk', qh, kh)
    a = jax.nn.softmax(logits, axis=-1)
    ctx = jnp.einsum('bhqk,bhkd->bhqd', a, vh)
    ctx = ctx.transpose(2, 0, 1, 3).reshape(S, B, D)
    attn_out = ctx @ params['out_proj_weight'].T + params['out_proj_bias']

    y = _layernorm(src + attn_out, params['ln1_g'], params['ln1_b'], eps)
    f = jnp.maximum(y @ params['w1'].T + params['b1'], 0.0) @ params['w2'].T + params['b2']
    return _layernorm(y + f, params['ln2_g'], params['ln2_b'], eps)


if __name__ == "__main__":
    key = jax.random.PRNGKey(0)
    ks = jax.random.split(key, 16)

    S, B, D, H, FF = 8, 2, 32, 4, 64       # seq=8, batch=2, d_model=32, 4 heads, ffn=64

    src = jax.random.normal(ks[0], (S, B, D), jnp.float32)
    pos = 0.1 * jax.random.normal(ks[1], (S, B, D), jnp.float32)

    params = {
        'in_proj_weight': 0.2 * jax.random.normal(ks[2], (3 * D, D), jnp.float32),
        'in_proj_bias': 0.05 * jax.random.normal(ks[3], (3 * D,), jnp.float32),
        'out_proj_weight': 0.2 * jax.random.normal(ks[4], (D, D), jnp.float32),
        'out_proj_bias': 0.05 * jax.random.normal(ks[5], (D,), jnp.float32),
        'w1': 0.2 * jax.random.normal(ks[6], (FF, D), jnp.float32),
        'b1': 0.05 * jax.random.normal(ks[7], (FF,), jnp.float32),
        'w2': 0.2 * jax.random.normal(ks[8], (D, FF), jnp.float32),
        'b2': 0.05 * jax.random.normal(ks[9], (D,), jnp.float32),
        'ln1_g': 1.0 + 0.1 * jax.random.normal(ks[10], (D,), jnp.float32),
        'ln1_b': 0.05 * jax.random.normal(ks[11], (D,), jnp.float32),
        'ln2_g': 1.0 + 0.1 * jax.random.normal(ks[12], (D,), jnp.float32),
        'ln2_b': 0.05 * jax.random.normal(ks[13], (D,), jnp.float32),
    }

    out = transformer_encoder_layer(src, pos, params, nhead=H)
    out = jax.block_until_ready(out)

    ref = _reference(src, pos, params, nhead=H)

    assert out.shape == (S, B, D), out.shape
    # Tolerance reflects bf16 MXU operands (f32 accumulation) vs the f32 reference.
    np.testing.assert_allclose(np.asarray(out), np.asarray(ref), rtol=5e-2, atol=5e-2)
    print("KERNEL_OK")
</pallas_src>

<mosaic_0001>
module attributes {stable_mosaic.version = 11 : i64} {
  func.func @_encoder_layer_kernel(%arg0: i32, %arg1: memref<1x8x32xf32, #tpu.memory_space<vmem>>, %arg2: memref<1x8x32xf32, #tpu.memory_space<vmem>>, %arg3: memref<4x32x8xbf16, #tpu.memory_space<vmem>>, %arg4: memref<4x32x8xbf16, #tpu.memory_space<vmem>>, %arg5: memref<4x32x8xbf16, #tpu.memory_space<vmem>>, %arg6: memref<4x1x8xf32, #tpu.memory_space<vmem>>, %arg7: memref<4x1x8xf32, #tpu.memory_space<vmem>>, %arg8: memref<4x1x8xf32, #tpu.memory_space<vmem>>, %arg9: memref<32x32xbf16, #tpu.memory_space<vmem>>, %arg10: memref<32x64xbf16, #tpu.memory_space<vmem>>, %arg11: memref<1x64xf32, #tpu.memory_space<vmem>>, %arg12: memref<64x32xbf16, #tpu.memory_space<vmem>>, %arg13: memref<6x32xf32, #tpu.memory_space<vmem>>, %arg14: memref<1x8x32xf32, #tpu.memory_space<vmem>>, %arg15: memref<8x32xf32, #tpu.memory_space<vmem>>) attributes {dimension_semantics = [#tpu.dimension_semantics<parallel>], iteration_bounds = array<i64: 2>, scalar_prefetch = 0 : i64, scratch_operands = 1 : i64, tpu.core_type = #tpu.core_type<tc>, window_params = [{transform_indices = @transform_0, window_bounds = array<i64: 1, 8, 32>}, {transform_indices = @transform_1, window_bounds = array<i64: 1, 8, 32>}, {pipeline_mode = #tpu.pipeline_mode<synchronous>, transform_indices = @transform_2, window_bounds = array<i64: 4, 32, 8>}, {pipeline_mode = #tpu.pipeline_mode<synchronous>, transform_indices = @transform_3, window_bounds = array<i64: 4, 32, 8>}, {pipeline_mode = #tpu.pipeline_mode<synchronous>, transform_indices = @transform_4, window_bounds = array<i64: 4, 32, 8>}, {pipeline_mode = #tpu.pipeline_mode<synchronous>, transform_indices = @transform_5, window_bounds = array<i64: 4, 1, 8>}, {pipeline_mode = #tpu.pipeline_mode<synchronous>, transform_indices = @transform_6, window_bounds = array<i64: 4, 1, 8>}, {pipeline_mode = #tpu.pipeline_mode<synchronous>, transform_indices = @transform_7, window_bounds = array<i64: 4, 1, 8>}, {pipeline_mode = #tpu.pipeline_mode<synchronous>, transform_indices = @transform_8, window_bounds = array<i64: 32, 32>}, {pipeline_mode = #tpu.pipeline_mode<synchronous>, transform_indices = @transform_9, window_bounds = array<i64: 32, 64>}, {pipeline_mode = #tpu.pipeline_mode<synchronous>, transform_indices = @transform_10, window_bounds = array<i64: 1, 64>}, {pipeline_mode = #tpu.pipeline_mode<synchronous>, transform_indices = @transform_11, window_bounds = array<i64: 64, 32>}, {pipeline_mode = #tpu.pipeline_mode<synchronous>, transform_indices = @transform_12, window_bounds = array<i64: 6, 32>}, {transform_indices = @transform_13, window_bounds = array<i64: 1, 8, 32>}]} {
    %c0 = arith.constant 0 : index
    %c0_0 = arith.constant 0 : index
    %c0_1 = arith.constant 0 : index
    %0 = vector.load %arg1[%c0, %c0_0, %c0_1] : memref<1x8x32xf32, #tpu.memory_space<vmem>>, vector<1x8x32xf32>
    %1 = vector.shape_cast %0 : vector<1x8x32xf32> to vector<8x32xf32>
    %c0_2 = arith.constant 0 : index
    %c0_3 = arith.constant 0 : index
    %c0_4 = arith.constant 0 : index
    %2 = vector.load %arg2[%c0_2, %c0_3, %c0_4] : memref<1x8x32xf32, #tpu.memory_space<vmem>>, vector<1x8x32xf32>
    %3 = vector.shape_cast %2 : vector<1x8x32xf32> to vector<8x32xf32>
    %4 = arith.addf %1, %3 : vector<8x32xf32>
    %5 = arith.truncf %1 : vector<8x32xf32> to vector<8x32xbf16>
    %6 = arith.truncf %4 : vector<8x32xf32> to vector<8x32xbf16>
    %c0_5 = arith.constant 0 : index
    %c0_6 = arith.constant 0 : index
    %c0_7 = arith.constant 0 : index
    %7 = vector.load %arg3[%c0_5, %c0_6, %c0_7] : memref<4x32x8xbf16, #tpu.memory_space<vmem>>, vector<1x32x8xbf16>
    %8 = vector.shape_cast %7 : vector<1x32x8xbf16> to vector<32x8xbf16>
    %cst = arith.constant dense<0.000000e+00> : vector<8x8xf32>
    %9 = tpu.matmul %6, %8, %cst {dimension_numbers = #tpu.dot_dimension_numbers<[1], [0], [0], [1], [0, 0, 1, 1], [], []>} : vector<8x32xbf16>, vector<32x8xbf16>, vector<8x8xf32> -> vector<8x8xf32>
    %c0_8 = arith.constant 0 : index
    %c0_9 = arith.constant 0 : index
    %c0_10 = arith.constant 0 : index
    %10 = vector.load %arg6[%c0_8, %c0_9, %c0_10] : memref<4x1x8xf32, #tpu.memory_space<vmem>>, vector<1x1x8xf32>
    %11 = vector.shape_cast %10 : vector<1x1x8xf32> to vector<1x8xf32>
    %12 = vector.broadcast %11 : vector<1x8xf32> to vector<8x8xf32>
    %13 = arith.addf %9, %12 : vector<8x8xf32>
    %c0_11 = arith.constant 0 : index
    %c0_12 = arith.constant 0 : index
    %c0_13 = arith.constant 0 : index
    %14 = vector.load %arg4[%c0_11, %c0_12, %c0_13] : memref<4x32x8xbf16, #tpu.memory_space<vmem>>, vector<1x32x8xbf16>
    %15 = vector.shape_cast %14 : vector<1x32x8xbf16> to vector<32x8xbf16>
    %cst_14 = arith.constant dense<0.000000e+00> : vector<8x8xf32>
    %16 = tpu.matmul %6, %15, %cst_14 {dimension_numbers = #tpu.dot_dimension_numbers<[1], [0], [0], [1], [0, 0, 1, 1], [], []>} : vector<8x32xbf16>, vector<32x8xbf16>, vector<8x8xf32> -> vector<8x8xf32>
    %c0_15 = arith.constant 0 : index
    %c0_16 = arith.constant 0 : index
    %c0_17 = arith.constant 0 : index
    %17 = vector.load %arg7[%c0_15, %c0_16, %c0_17] : memref<4x1x8xf32, #tpu.memory_space<vmem>>, vector<1x1x8xf32>
    %18 = vector.shape_cast %17 : vector<1x1x8xf32> to vector<1x8xf32>
    %19 = vector.broadcast %18 : vector<1x8xf32> to vector<8x8xf32>
    %20 = arith.addf %16, %19 : vector<8x8xf32>
    %c0_18 = arith.constant 0 : index
    %c0_19 = arith.constant 0 : index
    %c0_20 = arith.constant 0 : index
    %21 = vector.load %arg5[%c0_18, %c0_19, %c0_20] : memref<4x32x8xbf16, #tpu.memory_space<vmem>>, vector<1x32x8xbf16>
    %22 = vector.shape_cast %21 : vector<1x32x8xbf16> to vector<32x8xbf16>
    %cst_21 = arith.constant dense<0.000000e+00> : vector<8x8xf32>
    %23 = tpu.matmul %5, %22, %cst_21 {dimension_numbers = #tpu.dot_dimension_numbers<[1], [0], [0], [1], [0, 0, 1, 1], [], []>} : vector<8x32xbf16>, vector<32x8xbf16>, vector<8x8xf32> -> vector<8x8xf32>
    %c0_22 = arith.constant 0 : index
    %c0_23 = arith.constant 0 : index
    %c0_24 = arith.constant 0 : index
    %24 = vector.load %arg8[%c0_22, %c0_23, %c0_24] : memref<4x1x8xf32, #tpu.memory_space<vmem>>, vector<1x1x8xf32>
    %25 = vector.shape_cast %24 : vector<1x1x8xf32> to vector<1x8xf32>
    %26 = vector.broadcast %25 : vector<1x8xf32> to vector<8x8xf32>
    %27 = arith.addf %23, %26 : vector<8x8xf32>
    %28 = arith.truncf %13 : vector<8x8xf32> to vector<8x8xbf16>
    %29 = arith.truncf %20 : vector<8x8xf32> to vector<8x8xbf16>
    "tpu.trace_start"() <{level = 10 : i32, message = "qd,kd->qk"}> : () -> ()
    %cst_25 = arith.constant dense<0.000000e+00> : vector<8x8xf32>
    %30 = tpu.matmul %28, %29, %cst_25 {dimension_numbers = #tpu.dot_dimension_numbers<[1], [1], [0], [0], [0, 0, 1, 0], [], []>} : vector<8x8xbf16>, vector<8x8xbf16>, vector<8x8xf32> -> vector<8x8xf32>
    "tpu.trace_stop"() : () -> ()
    %cst_26 = arith.constant dense<0xFF800000> : vector<8xf32>
    %31 = vector.multi_reduction <maximumf>, %30, %cst_26 [1] : vector<8x8xf32> to vector<8xf32>
    %32 = vector.shape_cast %31 : vector<8xf32> to vector<8x1xf32>
    %33 = vector.broadcast %32 : vector<8x1xf32> to vector<8x8xf32>
    %34 = arith.subf %30, %33 : vector<8x8xf32>
    %35 = math.exp %34 : vector<8x8xf32>
    %cst_27 = arith.constant dense<0.000000e+00> : vector<8xf32>
    %36 = vector.multi_reduction <add>, %35, %cst_27 [1] : vector<8x8xf32> to vector<8xf32>
    %37 = vector.shape_cast %36 : vector<8xf32> to vector<8x1xf32>
    %38 = tpu.reciprocal %37 {approx = true} : vector<8x1xf32> -> vector<8x1xf32>
    %39 = vector.broadcast %38 : vector<8x1xf32> to vector<8x8xf32>
    %40 = arith.mulf %35, %39 : vector<8x8xf32>
    %41 = arith.truncf %40 : vector<8x8xf32> to vector<8x8xbf16>
    %42 = arith.truncf %27 : vector<8x8xf32> to vector<8x8xbf16>
    %cst_28 = arith.constant dense<0.000000e+00> : vector<8x8xf32>
    %43 = tpu.matmul %41, %42, %cst_28 {dimension_numbers = #tpu.dot_dimension_numbers<[1], [0], [0], [1], [0, 0, 1, 1], [], []>} : vector<8x8xbf16>, vector<8x8xbf16>, vector<8x8xf32> -> vector<8x8xf32>
    %c0_29 = arith.constant 0 : index
    %c0_30 = arith.constant 0 : index
    %44 = vector.load %arg15[%c0_29, %c0_30] : memref<8x32xf32, #tpu.memory_space<vmem>>, vector<8x8xf32>
    tpu.vector_store %arg15[%c0_29, %c0_30], %43 {strides = array<i32>} : memref<8x32xf32, #tpu.memory_space<vmem>>, vector<8x8xf32>,
    %c1 = arith.constant 1 : index
    %c0_31 = arith.constant 0 : index
    %c0_32 = arith.constant 0 : index
    %45 = vector.load %arg3[%c1, %c0_31, %c0_32] : memref<4x32x8xbf16, #tpu.memory_space<vmem>>, vector<1x32x8xbf16>
    %46 = vector.shape_cast %45 : vector<1x32x8xbf16> to vector<32x8xbf16>
    %cst_33 = arith.constant dense<0.000000e+00> : vector<8x8xf32>
    %47 = tpu.matmul %6, %46, %cst_33 {dimension_numbers = #tpu.dot_dimension_numbers<[1], [0], [0], [1], [0, 0, 1, 1], [], []>} : vector<8x32xbf16>, vector<32x8xbf16>, vector<8x8xf32> -> vector<8x8xf32>
    %c1_34 = arith.constant 1 : index
    %c0_35 = arith.constant 0 : index
    %c0_36 = arith.constant 0 : index
    %48 = vector.load %arg6[%c1_34, %c0_35, %c0_36] : memref<4x1x8xf32, #tpu.memory_space<vmem>>, vector<1x1x8xf32>
    %49 = vector.shape_cast %48 : vector<1x1x8xf32> to vector<1x8xf32>
    %50 = vector.broadcast %49 : vector<1x8xf32> to vector<8x8xf32>
    %51 = arith.addf %47, %50 : vector<8x8xf32>
    %c1_37 = arith.constant 1 : index
    %c0_38 = arith.constant 0 : index
    %c0_39 = arith.constant 0 : index
    %52 = vector.load %arg4[%c1_37, %c0_38, %c0_39] : memref<4x32x8xbf16, #tpu.memory_space<vmem>>, vector<1x32x8xbf16>
    %53 = vector.shape_cast %52 : vector<1x32x8xbf16> to vector<32x8xbf16>
    %cst_40 = arith.constant dense<0.000000e+00> : vector<8x8xf32>
    %54 = tpu.matmul %6, %53, %cst_40 {dimension_numbers = #tpu.dot_dimension_numbers<[1], [0], [0], [1], [0, 0, 1, 1], [], []>} : vector<8x32xbf16>, vector<32x8xbf16>, vector<8x8xf32> -> vector<8x8xf32>
    %c1_41 = arith.constant 1 : index
    %c0_42 = arith.constant 0 : index
    %c0_43 = arith.constant 0 : index
    %55 = vector.load %arg7[%c1_41, %c0_42, %c0_43] : memref<4x1x8xf32, #tpu.memory_space<vmem>>, vector<1x1x8xf32>
    %56 = vector.shape_cast %55 : vector<1x1x8xf32> to vector<1x8xf32>
    %57 = vector.broadcast %56 : vector<1x8xf32> to vector<8x8xf32>
    %58 = arith.addf %54, %57 : vector<8x8xf32>
    %c1_44 = arith.constant 1 : index
    %c0_45 = arith.constant 0 : index
    %c0_46 = arith.constant 0 : index
    %59 = vector.load %arg5[%c1_44, %c0_45, %c0_46] : memref<4x32x8xbf16, #tpu.memory_space<vmem>>, vector<1x32x8xbf16>
    %60 = vector.shape_cast %59 : vector<1x32x8xbf16> to vector<32x8xbf16>
    %cst_47 = arith.constant dense<0.000000e+00> : vector<8x8xf32>
    %61 = tpu.matmul %5, %60, %cst_47 {dimension_numbers = #tpu.dot_dimension_numbers<[1], [0], [0], [1], [0, 0, 1, 1], [], []>} : vector<8x32xbf16>, vector<32x8xbf16>, vector<8x8xf32> -> vector<8x8xf32>
    %c1_48 = arith.constant 1 : index
    %c0_49 = arith.constant 0 : index
    %c0_50 = arith.constant 0 : index
    %62 = vector.load %arg8[%c1_48, %c0_49, %c0_50] : memref<4x1x8xf32, #tpu.memory_space<vmem>>, vector<1x1x8xf32>
    %63 = vector.shape_cast %62 : vector<1x1x8xf32> to vector<1x8xf32>
    %64 = vector.broadcast %63 : vector<1x8xf32> to vector<8x8xf32>
    %65 = arith.addf %61, %64 : vector<8x8xf32>
    %66 = arith.truncf %51 : vector<8x8xf32> to vector<8x8xbf16>
    %67 = arith.truncf %58 : vector<8x8xf32> to vector<8x8xbf16>
    "tpu.trace_start"() <{level = 10 : i32, message = "qd,kd->qk"}> : () -> ()
    %cst_51 = arith.constant dense<0.000000e+00> : vector<8x8xf32>
    %68 = tpu.matmul %66, %67, %cst_51 {dimension_numbers = #tpu.dot_dimension_numbers<[1], [1], [0], [0], [0, 0, 1, 0], [], []>} : vector<8x8xbf16>, vector<8x8xbf16>, vector<8x8xf32> -> vector<8x8xf32>
    "tpu.trace_stop"() : () -> ()
    %cst_52 = arith.constant dense<0xFF800000> : vector<8xf32>
    %69 = vector.multi_reduction <maximumf>, %68, %cst_52 [1] : vector<8x8xf32> to vector<8xf32>
    %70 = vector.shape_cast %69 : vector<8xf32> to vector<8x1xf32>
    %71 = vector.broadcast %70 : vector<8x1xf32> to vector<8x8xf32>
    %72 = arith.subf %68, %71 : vector<8x8xf32>
    %73 = math.exp %72 : vector<8x8xf32>
    %cst_53 = arith.constant dense<0.000000e+00> : vector<8xf32>
    %74 = vector.multi_reduction <add>, %73, %cst_53 [1] : vector<8x8xf32> to vector<8xf32>
    %75 = vector.shape_cast %74 : vector<8xf32> to vector<8x1xf32>
    %76 = tpu.reciprocal %75 {approx = true} : vector<8x1xf32> -> vector<8x1xf32>
    %77 = vector.broadcast %76 : vector<8x1xf32> to vector<8x8xf32>
    %78 = arith.mulf %73, %77 : vector<8x8xf32>
    %79 = arith.truncf %78 : vector<8x8xf32> to vector<8x8xbf16>
    %80 = arith.truncf %65 : vector<8x8xf32> to vector<8x8xbf16>
    %cst_54 = arith.constant dense<0.000000e+00> : vector<8x8xf32>
    %81 = tpu.matmul %79, %80, %cst_54 {dimension_numbers = #tpu.dot_dimension_numbers<[1], [0], [0], [1], [0, 0, 1, 1], [], []>} : vector<8x8xbf16>, vector<8x8xbf16>, vector<8x8xf32> -> vector<8x8xf32>
    %c0_55 = arith.constant 0 : index
    %c8 = arith.constant 8 : index
    %82 = vector.load %arg15[%c0_55, %c8] : memref<8x32xf32, #tpu.memory_space<vmem>>, vector<8x8xf32>
    tpu.vector_store %arg15[%c0_55, %c8], %81 {strides = array<i32>} : memref<8x32xf32, #tpu.memory_space<vmem>>, vector<8x8xf32>,
    %c2 = arith.constant 2 : index
    %c0_56 = arith.constant 0 : index
    %c0_57 = arith.constant 0 : index
    %83 = vector.load %arg3[%c2, %c0_56, %c0_57] : memref<4x32x8xbf16, #tpu.memory_space<vmem>>, vector<1x32x8xbf16>
    %84 = vector.shape_cast %83 : vector<1x32x8xbf16> to vector<32x8xbf16>
    %cst_58 = arith.constant dense<0.000000e+00> : vector<8x8xf32>
    %85 = tpu.matmul %6, %84, %cst_58 {dimension_numbers = #tpu.dot_dimension_numbers<[1], [0], [0], [1], [0, 0, 1, 1], [], []>} : vector<8x32xbf16>, vector<32x8xbf16>, vector<8x8xf32> -> vector<8x8xf32>
    %c2_59 = arith.constant 2 : index
    %c0_60 = arith.constant 0 : index
    %c0_61 = arith.constant 0 : index
    %86 = vector.load %arg6[%c2_59, %c0_60, %c0_61] : memref<4x1x8xf32, #tpu.memory_space<vmem>>, vector<1x1x8xf32>
    %87 = vector.shape_cast %86 : vector<1x1x8xf32> to vector<1x8xf32>
    %88 = vector.broadcast %87 : vector<1x8xf32> to vector<8x8xf32>
    %89 = arith.addf %85, %88 : vector<8x8xf32>
    %c2_62 = arith.constant 2 : index
    %c0_63 = arith.constant 0 : index
    %c0_64 = arith.constant 0 : index
    %90 = vector.load %arg4[%c2_62, %c0_63, %c0_64] : memref<4x32x8xbf16, #tpu.memory_space<vmem>>, vector<1x32x8xbf16>
    %91 = vector.shape_cast %90 : vector<1x32x8xbf16> to vector<32x8xbf16>
    %cst_65 = arith.constant dense<0.000000e+00> : vector<8x8xf32>
    %92 = tpu.matmul %6, %91, %cst_65 {dimension_numbers = #tpu.dot_dimension_numbers<[1], [0], [0], [1], [0, 0, 1, 1], [], []>} : vector<8x32xbf16>, vector<32x8xbf16>, vector<8x8xf32> -> vector<8x8xf32>
    %c2_66 = arith.constant 2 : index
    %c0_67 = arith.constant 0 : index
    %c0_68 = arith.constant 0 : index
    %93 = vector.load %arg7[%c2_66, %c0_67, %c0_68] : memref<4x1x8xf32, #tpu.memory_space<vmem>>, vector<1x1x8xf32>
    %94 = vector.shape_cast %93 : vector<1x1x8xf32> to vector<1x8xf32>
    %95 = vector.broadcast %94 : vector<1x8xf32> to vector<8x8xf32>
    %96 = arith.addf %92, %95 : vector<8x8xf32>
    %c2_69 = arith.constant 2 : index
    %c0_70 = arith.constant 0 : index
    %c0_71 = arith.constant 0 : index
    %97 = vector.load %arg5[%c2_69, %c0_70, %c0_71] : memref<4x32x8xbf16, #tpu.memory_space<vmem>>, vector<1x32x8xbf16>
    %98 = vector.shape_cast %97 : vector<1x32x8xbf16> to vector<32x8xbf16>
    %cst_72 = arith.constant dense<0.000000e+00> : vector<8x8xf32>
    %99 = tpu.matmul %5, %98, %cst_72 {dimension_numbers = #tpu.dot_dimension_numbers<[1], [0], [0], [1], [0, 0, 1, 1], [], []>} : vector<8x32xbf16>, vector<32x8xbf16>, vector<8x8xf32> -> vector<8x8xf32>
    %c2_73 = arith.constant 2 : index
    %c0_74 = arith.constant 0 : index
    %c0_75 = arith.constant 0 : index
    %100 = vector.load %arg8[%c2_73, %c0_74, %c0_75] : memref<4x1x8xf32, #tpu.memory_space<vmem>>, vector<1x1x8xf32>
    %101 = vector.shape_cast %100 : vector<1x1x8xf32> to vector<1x8xf32>
    %102 = vector.broadcast %101 : vector<1x8xf32> to vector<8x8xf32>
    %103 = arith.addf %99, %102 : vector<8x8xf32>
    %104 = arith.truncf %89 : vector<8x8xf32> to vector<8x8xbf16>
    %105 = arith.truncf %96 : vector<8x8xf32> to vector<8x8xbf16>
    "tpu.trace_start"() <{level = 10 : i32, message = "qd,kd->qk"}> : () -> ()
    %cst_76 = arith.constant dense<0.000000e+00> : vector<8x8xf32>
    %106 = tpu.matmul %104, %105, %cst_76 {dimension_numbers = #tpu.dot_dimension_numbers<[1], [1], [0], [0], [0, 0, 1, 0], [], []>} : vector<8x8xbf16>, vector<8x8xbf16>, vector<8x8xf32> -> vector<8x8xf32>
    "tpu.trace_stop"() : () -> ()
    %cst_77 = arith.constant dense<0xFF800000> : vector<8xf32>
    %107 = vector.multi_reduction <maximumf>, %106, %cst_77 [1] : vector<8x8xf32> to vector<8xf32>
    %108 = vector.shape_cast %107 : vector<8xf32> to vector<8x1xf32>
    %109 = vector.broadcast %108 : vector<8x1xf32> to vector<8x8xf32>
    %110 = arith.subf %106, %109 : vector<8x8xf32>
    %111 = math.exp %110 : vector<8x8xf32>
    %cst_78 = arith.constant dense<0.000000e+00> : vector<8xf32>
    %112 = vector.multi_reduction <add>, %111, %cst_78 [1] : vector<8x8xf32> to vector<8xf32>
    %113 = vector.shape_cast %112 : vector<8xf32> to vector<8x1xf32>
    %114 = tpu.reciprocal %113 {approx = true} : vector<8x1xf32> -> vector<8x1xf32>
    %115 = vector.broadcast %114 : vector<8x1xf32> to vector<8x8xf32>
    %116 = arith.mulf %111, %115 : vector<8x8xf32>
    %117 = arith.truncf %116 : vector<8x8xf32> to vector<8x8xbf16>
    %118 = arith.truncf %103 : vector<8x8xf32> to vector<8x8xbf16>
    %cst_79 = arith.constant dense<0.000000e+00> : vector<8x8xf32>
    %119 = tpu.matmul %117, %118, %cst_79 {dimension_numbers = #tpu.dot_dimension_numbers<[1], [0], [0], [1], [0, 0, 1, 1], [], []>} : vector<8x8xbf16>, vector<8x8xbf16>, vector<8x8xf32> -> vector<8x8xf32>
    %c0_80 = arith.constant 0 : index
    %c16 = arith.constant 16 : index
    %120 = vector.load %arg15[%c0_80, %c16] : memref<8x32xf32, #tpu.memory_space<vmem>>, vector<8x8xf32>
    tpu.vector_store %arg15[%c0_80, %c16], %119 {strides = array<i32>} : memref<8x32xf32, #tpu.memory_space<vmem>>, vector<8x8xf32>,
    %c3 = arith.constant 3 : index
    %c0_81 = arith.constant 0 : index
    %c0_82 = arith.constant 0 : index
    %121 = vector.load %arg3[%c3, %c0_81, %c0_82] : memref<4x32x8xbf16, #tpu.memory_space<vmem>>, vector<1x32x8xbf16>
    %122 = vector.shape_cast %121 : vector<1x32x8xbf16> to vector<32x8xbf16>
    %cst_83 = arith.constant dense<0.000000e+00> : vector<8x8xf32>
    %123 = tpu.matmul %6, %122, %cst_83 {dimension_numbers = #tpu.dot_dimension_numbers<[1], [0], [0], [1], [0, 0, 1, 1], [], []>} : vector<8x32xbf16>, vector<32x8xbf16>, vector<8x8xf32> -> vector<8x8xf32>
    %c3_84 = arith.constant 3 : index
    %c0_85 = arith.constant 0 : index
    %c0_86 = arith.constant 0 : index
    %124 = vector.load %arg6[%c3_84, %c0_85, %c0_86] : memref<4x1x8xf32, #tpu.memory_space<vmem>>, vector<1x1x8xf32>
    %125 = vector.shape_cast %124 : vector<1x1x8xf32> to vector<1x8xf32>
    %126 = vector.broadcast %125 : vector<1x8xf32> to vector<8x8xf32>
    %127 = arith.addf %123, %126 : vector<8x8xf32>
    %c3_87 = arith.constant 3 : index
    %c0_88 = arith.constant 0 : index
    %c0_89 = arith.constant 0 : index
    %128 = vector.load %arg4[%c3_87, %c0_88, %c0_89] : memref<4x32x8xbf16, #tpu.memory_space<vmem>>, vector<1x32x8xbf16>
    %129 = vector.shape_cast %128 : vector<1x32x8xbf16> to vector<32x8xbf16>
    %cst_90 = arith.constant dense<0.000000e+00> : vector<8x8xf32>
    %130 = tpu.matmul %6, %129, %cst_90 {dimension_numbers = #tpu.dot_dimension_numbers<[1], [0], [0], [1], [0, 0, 1, 1], [], []>} : vector<8x32xbf16>, vector<32x8xbf16>, vector<8x8xf32> -> vector<8x8xf32>
    %c3_91 = arith.constant 3 : index
    %c0_92 = arith.constant 0 : index
    %c0_93 = arith.constant 0 : index
    %131 = vector.load %arg7[%c3_91, %c0_92, %c0_93] : memref<4x1x8xf32, #tpu.memory_space<vmem>>, vector<1x1x8xf32>
    %132 = vector.shape_cast %131 : vector<1x1x8xf32> to vector<1x8xf32>
    %133 = vector.broadcast %132 : vector<1x8xf32> to vector<8x8xf32>
    %134 = arith.addf %130, %133 : vector<8x8xf32>
    %c3_94 = arith.constant 3 : index
    %c0_95 = arith.constant 0 : index
    %c0_96 = arith.constant 0 : index
    %135 = vector.load %arg5[%c3_94, %c0_95, %c0_96] : memref<4x32x8xbf16, #tpu.memory_space<vmem>>, vector<1x32x8xbf16>
    %136 = vector.shape_cast %135 : vector<1x32x8xbf16> to vector<32x8xbf16>
    %cst_97 = arith.constant dense<0.000000e+00> : vector<8x8xf32>
    %137 = tpu.matmul %5, %136, %cst_97 {dimension_numbers = #tpu.dot_dimension_numbers<[1], [0], [0], [1], [0, 0, 1, 1], [], []>} : vector<8x32xbf16>, vector<32x8xbf16>, vector<8x8xf32> -> vector<8x8xf32>
    %c3_98 = arith.constant 3 : index
    %c0_99 = arith.constant 0 : index
    %c0_100 = arith.constant 0 : index
    %138 = vector.load %arg8[%c3_98, %c0_99, %c0_100] : memref<4x1x8xf32, #tpu.memory_space<vmem>>, vector<1x1x8xf32>
    %139 = vector.shape_cast %138 : vector<1x1x8xf32> to vector<1x8xf32>
    %140 = vector.broadcast %139 : vector<1x8xf32> to vector<8x8xf32>
    %141 = arith.addf %137, %140 : vector<8x8xf32>
    %142 = arith.truncf %127 : vector<8x8xf32> to vector<8x8xbf16>
    %143 = arith.truncf %134 : vector<8x8xf32> to vector<8x8xbf16>
    "tpu.trace_start"() <{level = 10 : i32, message = "qd,kd->qk"}> : () -> ()
    %cst_101 = arith.constant dense<0.000000e+00> : vector<8x8xf32>
    %144 = tpu.matmul %142, %143, %cst_101 {dimension_numbers = #tpu.dot_dimension_numbers<[1], [1], [0], [0], [0, 0, 1, 0], [], []>} : vector<8x8xbf16>, vector<8x8xbf16>, vector<8x8xf32> -> vector<8x8xf32>
    "tpu.trace_stop"() : () -> ()
    %cst_102 = arith.constant dense<0xFF800000> : vector<8xf32>
    %145 = vector.multi_reduction <maximumf>, %144, %cst_102 [1] : vector<8x8xf32> to vector<8xf32>
    %146 = vector.shape_cast %145 : vector<8xf32> to vector<8x1xf32>
    %147 = vector.broadcast %146 : vector<8x1xf32> to vector<8x8xf32>
    %148 = arith.subf %144, %147 : vector<8x8xf32>
    %149 = math.exp %148 : vector<8x8xf32>
    %cst_103 = arith.constant dense<0.000000e+00> : vector<8xf32>
    %150 = vector.multi_reduction <add>, %149, %cst_103 [1] : vector<8x8xf32> to vector<8xf32>
    %151 = vector.shape_cast %150 : vector<8xf32> to vector<8x1xf32>
    %152 = tpu.reciprocal %151 {approx = true} : vector<8x1xf32> -> vector<8x1xf32>
    %153 = vector.broadcast %152 : vector<8x1xf32> to vector<8x8xf32>
    %154 = arith.mulf %149, %153 : vector<8x8xf32>
    %155 = arith.truncf %154 : vector<8x8xf32> to vector<8x8xbf16>
    %156 = arith.truncf %141 : vector<8x8xf32> to vector<8x8xbf16>
    %cst_104 = arith.constant dense<0.000000e+00> : vector<8x8xf32>
    %157 = tpu.matmul %155, %156, %cst_104 {dimension_numbers = #tpu.dot_dimension_numbers<[1], [0], [0], [1], [0, 0, 1, 1], [], []>} : vector<8x8xbf16>, vector<8x8xbf16>, vector<8x8xf32> -> vector<8x8xf32>
    %c0_105 = arith.constant 0 : index
    %c24 = arith.constant 24 : index
    %158 = vector.load %arg15[%c0_105, %c24] : memref<8x32xf32, #tpu.memory_space<vmem>>, vector<8x8xf32>
    tpu.vector_store %arg15[%c0_105, %c24], %157 {strides = array<i32>} : memref<8x32xf32, #tpu.memory_space<vmem>>, vector<8x8xf32>,
    %c0_106 = arith.constant 0 : index
    %c0_107 = arith.constant 0 : index
    %159 = vector.load %arg13[%c0_106, %c0_107] : memref<6x32xf32, #tpu.memory_space<vmem>>, vector<1x32xf32>
    %c1_108 = arith.constant 1 : index
    %c0_109 = arith.constant 0 : index
    %160 = vector.load %arg13[%c1_108, %c0_109] : memref<6x32xf32, #tpu.memory_space<vmem>>, vector<1x32xf32>
    %c2_110 = arith.constant 2 : index
    %c0_111 = arith.constant 0 : index
    %161 = vector.load %arg13[%c2_110, %c0_111] : memref<6x32xf32, #tpu.memory_space<vmem>>, vector<1x32xf32>
    %c3_112 = arith.constant 3 : index
    %c0_113 = arith.constant 0 : index
    %162 = vector.load %arg13[%c3_112, %c0_113] : memref<6x32xf32, #tpu.memory_space<vmem>>, vector<1x32xf32>
    %c4 = arith.constant 4 : index
    %c0_114 = arith.constant 0 : index
    %163 = vector.load %arg13[%c4, %c0_114] : memref<6x32xf32, #tpu.memory_space<vmem>>, vector<1x32xf32>
    %c5 = arith.constant 5 : index
    %c0_115 = arith.constant 0 : index
    %164 = vector.load %arg13[%c5, %c0_115] : memref<6x32xf32, #tpu.memory_space<vmem>>, vector<1x32xf32>
    %c0_116 = arith.constant 0 : index
    %c0_117 = arith.constant 0 : index
    %165 = vector.load %arg15[%c0_116, %c0_117] : memref<8x32xf32, #tpu.memory_space<vmem>>, vector<8x32xf32>
    %166 = arith.truncf %165 : vector<8x32xf32> to vector<8x32xbf16>
    %c0_118 = arith.constant 0 : index
    %c0_119 = arith.constant 0 : index
    %167 = vector.load %arg9[%c0_118, %c0_119] : memref<32x32xbf16, #tpu.memory_space<vmem>>, vector<32x32xbf16>
    %cst_120 = arith.constant dense<0.000000e+00> : vector<8x32xf32>
    %168 = tpu.matmul %166, %167, %cst_120 {dimension_numbers = #tpu.dot_dimension_numbers<[1], [0], [0], [1], [0, 0, 1, 1], [], []>} : vector<8x32xbf16>, vector<32x32xbf16>, vector<8x32xf32> -> vector<8x32xf32>
    %169 = vector.broadcast %159 : vector<1x32xf32> to vector<8x32xf32>
    %170 = arith.addf %168, %169 : vector<8x32xf32>
    %171 = arith.addf %1, %170 : vector<8x32xf32>
    %cst_121 = arith.constant dense<0.000000e+00> : vector<8xf32>
    %172 = vector.multi_reduction <add>, %171, %cst_121 [1] : vector<8x32xf32> to vector<8xf32>
    %173 = vector.shape_cast %172 : vector<8xf32> to vector<8x1xf32>
    %cst_122 = arith.constant 3.200000e+01 : f32
    %174 = vector.broadcast %cst_122 : f32 to vector<8x1xf32>
    %175 = arith.divf %173, %174 : vector<8x1xf32>
    %176 = vector.broadcast %175 : vector<8x1xf32> to vector<8x32xf32>
    %177 = arith.subf %171, %176 : vector<8x32xf32>
    %178 = vector.broadcast %175 : vector<8x1xf32> to vector<8x32xf32>
    %179 = arith.subf %171, %178 : vector<8x32xf32>
    %180 = arith.mulf %177, %179 : vector<8x32xf32>
    %cst_123 = arith.constant dense<0.000000e+00> : vector<8xf32>
    %181 = vector.multi_reduction <add>, %180, %cst_123 [1] : vector<8x32xf32> to vector<8xf32>
    %182 = vector.shape_cast %181 : vector<8xf32> to vector<8x1xf32>
    %cst_124 = arith.constant 3.200000e+01 : f32
    %183 = vector.broadcast %cst_124 : f32 to vector<8x1xf32>
    %184 = arith.divf %182, %183 : vector<8x1xf32>
    %185 = vector.broadcast %175 : vector<8x1xf32> to vector<8x32xf32>
    %186 = arith.subf %171, %185 : vector<8x32xf32>
    %cst_125 = arith.constant 9.99999974E-6 : f32
    %187 = vector.broadcast %cst_125 : f32 to vector<8x1xf32>
    %188 = arith.addf %184, %187 : vector<8x1xf32>
    %189 = math.rsqrt %188 : vector<8x1xf32>
    %190 = vector.broadcast %189 : vector<8x1xf32> to vector<8x32xf32>
    %191 = arith.mulf %186, %190 : vector<8x32xf32>
    %192 = vector.broadcast %160 : vector<1x32xf32> to vector<8x32xf32>
    %193 = arith.mulf %191, %192 : vector<8x32xf32>
    %194 = vector.broadcast %161 : vector<1x32xf32> to vector<8x32xf32>
    %195 = arith.addf %193, %194 : vector<8x32xf32>
    %196 = arith.truncf %195 : vector<8x32xf32> to vector<8x32xbf16>
    %c0_126 = arith.constant 0 : index
    %c0_127 = arith.constant 0 : index
    %197 = vector.load %arg10[%c0_126, %c0_127] : memref<32x64xbf16, #tpu.memory_space<vmem>>, vector<32x64xbf16>
    %cst_128 = arith.constant dense<0.000000e+00> : vector<8x64xf32>
    %198 = tpu.matmul %196, %197, %cst_128 {dimension_numbers = #tpu.dot_dimension_numbers<[1], [0], [0], [1], [0, 0, 1, 1], [], []>} : vector<8x32xbf16>, vector<32x64xbf16>, vector<8x64xf32> -> vector<8x64xf32>
    %c0_129 = arith.constant 0 : index
    %c0_130 = arith.constant 0 : index
    %199 = vector.load %arg11[%c0_129, %c0_130] : memref<1x64xf32, #tpu.memory_space<vmem>>, vector<1x64xf32>
    %200 = vector.broadcast %199 : vector<1x64xf32> to vector<8x64xf32>
    %201 = arith.addf %198, %200 : vector<8x64xf32>
    %cst_131 = arith.constant 0.000000e+00 : f32
    %202 = vector.broadcast %cst_131 : f32 to vector<8x64xf32>
    %203 = arith.maximumf %201, %202 : vector<8x64xf32>
    %204 = arith.truncf %203 : vector<8x64xf32> to vector<8x64xbf16>
    %c0_132 = arith.constant 0 : index
    %c0_133 = arith.constant 0 : index
    %205 = vector.load %arg12[%c0_132, %c0_133] : memref<64x32xbf16, #tpu.memory_space<vmem>>, vector<64x32xbf16>
    %cst_134 = arith.constant dense<0.000000e+00> : vector<8x32xf32>
    %206 = tpu.matmul %204, %205, %cst_134 {dimension_numbers = #tpu.dot_dimension_numbers<[1], [0], [0], [1], [0, 0, 1, 1], [], []>} : vector<8x64xbf16>, vector<64x32xbf16>, vector<8x32xf32> -> vector<8x32xf32>
    %207 = vector.broadcast %162 : vector<1x32xf32> to vector<8x32xf32>
    %208 = arith.addf %206, %207 : vector<8x32xf32>
    %209 = arith.addf %195, %208 : vector<8x32xf32>
    %cst_135 = arith.constant dense<0.000000e+00> : vector<8xf32>
    %210 = vector.multi_reduction <add>, %209, %cst_135 [1] : vector<8x32xf32> to vector<8xf32>
    %211 = vector.shape_cast %210 : vector<8xf32> to vector<8x1xf32>
    %cst_136 = arith.constant 3.200000e+01 : f32
    %212 = vector.broadcast %cst_136 : f32 to vector<8x1xf32>
    %213 = arith.divf %211, %212 : vector<8x1xf32>
    %214 = vector.broadcast %213 : vector<8x1xf32> to vector<8x32xf32>
    %215 = arith.subf %209, %214 : vector<8x32xf32>
    %216 = vector.broadcast %213 : vector<8x1xf32> to vector<8x32xf32>
    %217 = arith.subf %209, %216 : vector<8x32xf32>
    %218 = arith.mulf %215, %217 : vector<8x32xf32>
    %cst_137 = arith.constant dense<0.000000e+00> : vector<8xf32>
    %219 = vector.multi_reduction <add>, %218, %cst_137 [1] : vector<8x32xf32> to vector<8xf32>
    %220 = vector.shape_cast %219 : vector<8xf32> to vector<8x1xf32>
    %cst_138 = arith.constant 3.200000e+01 : f32
    %221 = vector.broadcast %cst_138 : f32 to vector<8x1xf32>
    %222 = arith.divf %220, %221 : vector<8x1xf32>
    %223 = vector.broadcast %213 : vector<8x1xf32> to vector<8x32xf32>
    %224 = arith.subf %209, %223 : vector<8x32xf32>
    %cst_139 = arith.constant 9.99999974E-6 : f32
    %225 = vector.broadcast %cst_139 : f32 to vector<8x1xf32>
    %226 = arith.addf %222, %225 : vector<8x1xf32>
    %227 = math.rsqrt %226 : vector<8x1xf32>
    %228 = vector.broadcast %227 : vector<8x1xf32> to vector<8x32xf32>
    %229 = arith.mulf %224, %228 : vector<8x32xf32>
    %230 = vector.broadcast %163 : vector<1x32xf32> to vector<8x32xf32>
    %231 = arith.mulf %229, %230 : vector<8x32xf32>
    %232 = vector.broadcast %164 : vector<1x32xf32> to vector<8x32xf32>
    %233 = arith.addf %231, %232 : vector<8x32xf32>
    %c0_140 = arith.constant 0 : index
    %c0_141 = arith.constant 0 : index
    %c0_142 = arith.constant 0 : index
    %234 = vector.load %arg14[%c0_140, %c0_141, %c0_142] : memref<1x8x32xf32, #tpu.memory_space<vmem>>, vector<1x8x32xf32>
    %235 = vector.shape_cast %234 : vector<1x8x32xf32> to vector<8x32xf32>
    %236 = vector.shape_cast %233 : vector<8x32xf32> to vector<1x8x32xf32>
    tpu.vector_store %arg14[%c0_140, %c0_141, %c0_142], %236 {strides = array<i32>} : memref<1x8x32xf32, #tpu.memory_space<vmem>>, vector<1x8x32xf32>,
    return
  }
  func.func @transform_0(%arg0: i32) -> (i32, i32, i32) {
    %c0_i32 = arith.constant 0 : i32
    %c0_i32_0 = arith.constant 0 : i32
    %c0_i32_1 = arith.constant 0 : i32
    return %arg0, %c0_i32, %c0_i32_0 : i32, i32, i32
  }
  func.func @transform_1(%arg0: i32) -> (i32, i32, i32) {
    %c0_i32 = arith.constant 0 : i32
    %c0_i32_0 = arith.constant 0 : i32
    %c0_i32_1 = arith.constant 0 : i32
    return %arg0, %c0_i32, %c0_i32_0 : i32, i32, i32
  }
  func.func @transform_2(%arg0: i32) -> (i32, i32, i32) {
    %c0_i32 = arith.constant 0 : i32
    %c0_i32_0 = arith.constant 0 : i32
    %c0_i32_1 = arith.constant 0 : i32
    %c0_i32_2 = arith.constant 0 : i32
    return %c0_i32, %c0_i32_0, %c0_i32_1 : i32, i32, i32
  }
  func.func @transform_3(%arg0: i32) -> (i32, i32, i32) {
    %c0_i32 = arith.constant 0 : i32
    %c0_i32_0 = arith.constant 0 : i32
    %c0_i32_1 = arith.constant 0 : i32
    %c0_i32_2 = arith.constant 0 : i32
    return %c0_i32, %c0_i32_0, %c0_i32_1 : i32, i32, i32
  }
  func.func @transform_4(%arg0: i32) -> (i32, i32, i32) {
    %c0_i32 = arith.constant 0 : i32
    %c0_i32_0 = arith.constant 0 : i32
    %c0_i32_1 = arith.constant 0 : i32
    %c0_i32_2 = arith.constant 0 : i32
    return %c0_i32, %c0_i32_0, %c0_i32_1 : i32, i32, i32
  }
  func.func @transform_5(%arg0: i32) -> (i32, i32, i32) {
    %c0_i32 = arith.constant 0 : i32
    %c0_i32_0 = arith.constant 0 : i32
    %c0_i32_1 = arith.constant 0 : i32
    %c0_i32_2 = arith.constant 0 : i32
    return %c0_i32, %c0_i32_0, %c0_i32_1 : i32, i32, i32
  }
  func.func @transform_6(%arg0: i32) -> (i32, i32, i32) {
    %c0_i32 = arith.constant 0 : i32
    %c0_i32_0 = arith.constant 0 : i32
    %c0_i32_1 = arith.constant 0 : i32
    %c0_i32_2 = arith.constant 0 : i32
    return %c0_i32, %c0_i32_0, %c0_i32_1 : i32, i32, i32
  }
  func.func @transform_7(%arg0: i32) -> (i32, i32, i32) {
    %c0_i32 = arith.constant 0 : i32
    %c0_i32_0 = arith.constant 0 : i32
    %c0_i32_1 = arith.constant 0 : i32
    %c0_i32_2 = arith.constant 0 : i32
    return %c0_i32, %c0_i32_0, %c0_i32_1 : i32, i32, i32
  }
  func.func @transform_8(%arg0: i32) -> (i32, i32) {
    %c0_i32 = arith.constant 0 : i32
    %c0_i32_0 = arith.constant 0 : i32
    %c0_i32_1 = arith.constant 0 : i32
    return %c0_i32, %c0_i32_0 : i32, i32
  }
  func.func @transform_9(%arg0: i32) -> (i32, i32) {
    %c0_i32 = arith.constant 0 : i32
    %c0_i32_0 = arith.constant 0 : i32
    %c0_i32_1 = arith.constant 0 : i32
    return %c0_i32, %c0_i32_0 : i32, i32
  }
  func.func @transform_10(%arg0: i32) -> (i32, i32) {
    %c0_i32 = arith.constant 0 : i32
    %c0_i32_0 = arith.constant 0 : i32
    %c0_i32_1 = arith.constant 0 : i32
    return %c0_i32, %c0_i32_0 : i32, i32
  }
  func.func @transform_11(%arg0: i32) -> (i32, i32) {
    %c0_i32 = arith.constant 0 : i32
    %c0_i32_0 = arith.constant 0 : i32
    %c0_i32_1 = arith.constant 0 : i32
    return %c0_i32, %c0_i32_0 : i32, i32
  }
  func.func @transform_12(%arg0: i32) -> (i32, i32) {
    %c0_i32 = arith.constant 0 : i32
    %c0_i32_0 = arith.constant 0 : i32
    %c0_i32_1 = arith.constant 0 : i32
    return %c0_i32, %c0_i32_0 : i32, i32
  }
  func.func @transform_13(%arg0: i32) -> (i32, i32, i32) {
    %c0_i32 = arith.constant 0 : i32
    %c0_i32_0 = arith.constant 0 : i32
    %c0_i32_1 = arith.constant 0 : i32
    return %arg0, %c0_i32, %c0_i32_0 : i32, i32, i32
  }
}

</mosaic_0001>

<bundles_post_ra>
// kernel: tpu_custom_call.1
= control target key start
LH: loop header
LB: loop body
LE: loop exit
PB: predicated region body
PF: predicated region fallthrough
CT: control target
= control target key end

     0   :  { %s3056_s0 = inlined_call_operand.vmem [shape: f32[2,8,32], index: 0, kind: input, shape index: {}]   ;;  %s3057_s1 = inlined_call_operand.vmem [shape: f32[2,8,32], index: 1, kind: input, shape index: {}]   ;;  %s3058_s2 = inlined_call_operand.vmem [shape: bf16[4,32,8], index: 2, kind: input, shape index: {}]   ;;  %s3059_s3 = inlined_call_operand.vmem [shape: bf16[4,32,8], index: 3, kind: input, shape index: {}]   ;;  %s3060_s4 = inlined_call_operand.vmem [shape: bf16[4,32,8], index: 4, kind: input, shape index: {}]   ;;  %s3061_s5 = inlined_call_operand.vmem [shape: f32[4,1,8], index: 5, kind: input, shape index: {}]   ;;  %s3062_s6 = inlined_call_operand.vmem [shape: f32[4,1,8], index: 6, kind: input, shape index: {}]   ;;  %s3063_s7 = inlined_call_operand.vmem [shape: f32[4,1,8], index: 7, kind: input, shape index: {}]   ;;  %s3064_s8 = inlined_call_operand.vmem [shape: bf16[32,32], index: 8, kind: input, shape index: {}]   ;;  %s3065_s9 = inlined_call_operand.vmem [shape: bf16[32,64], index: 9, kind: input, shape index: {}]   ;;  %s3066_s10 = inlined_call_operand.vmem [shape: f32[1,64], index: 10, kind: input, shape index: {}]   ;;  %s3067_s11 = inlined_call_operand.vmem [shape: bf16[64,32], index: 11, kind: input, shape index: {}]   ;;  %s3068_s12 = inlined_call_operand.vmem [shape: f32[6,32], index: 12, kind: input, shape index: {}]   ;;  %s3069_s13 = inlined_call_operand.hbm [shape: f32[2,8,32], index: 13, kind: output, shape index: {}]  }
   0x1   :  { %3071 = sst [smem:[#allocation8_spill]] %s3056_s0 }
   0x2   :  { %3072 = sst [smem:[#allocation9_spill]] %s3057_s1 }
   0x3   :  { %18 = vsyncpa [#allocation4], 0 }
   0x4   :  { %20 = vsyncpa [#allocation4 + $0x1], 0  ;;  %s2645_s25 = smov 0   ;;  %s2647_s26 = smov 0  }
   0x5   :  { %s2649_s27 = smov 0   ;;  %s2651_s28 = smov 0  }
   0x6 LB: > { %3073 = sst [smem:[#allocation6_spill]] %s2563_s27  ;;  %s2666_s29 = sadd.s32 4294967295, %s2567_s28   ;;  %s2567_s28 = sphi %s2651_s28, %s3083_s28   ;;  %s2563_s27 = sphi %s2649_s27, %s3080_s27   ;;  %s2559_s26 = sphi %s2647_s26, %s3082_s26   ;;  %s2555_s25 = sphi %s2645_s25, %s3081_s25  }
   0x7   : > { %s2044_s30 = sadd.s32 4294967294, %s2567_s28   ;;  %s2670_s14 = sadd.s32 1, %s2567_s28  }
   0x8   : > { %s316_s15 = sadd.s32 1, %s2563_s27  ;;  %s313_s16 = ssub.s32 %s2567_s28, %s2670_s14 }
   0x9   : > { %p326_p0 = scmp.ne.s32.totalorder %s2563_s27, %s2559_s26  ;;  %p314_p1 = scmp.eq.s32.totalorder %s313_s16, 0 }
   0xa   : > { %p327_p2 = scmp.eq.s32.totalorder %s2666_s29, 1  ;;  %p332_p3 = scmp.ne.s32.totalorder %s2559_s26, %s2555_s25 }
   0xb   : > { %p333_p4 = scmp.eq.s32.totalorder %s2044_s30, 1  ;;  %p2047_p7 = scmp.ge.s32.totalorder %s2567_s28, 1 }
   0xc   : > { %s2681_s17 = scalar_select %p314_p1, %s2563_s27, %s316_s15  }
   0xd   : > { %p2683_p5 = por %p327_p2, %p326_p0  ;;  %p2687_p6 = por %p333_p4, %p332_p3 }
   0xe   : > { %3074 = sst [smem:[#allocation7_spill]] %s2681_s17  ;;  %p398_p8 = scmp.lt.s32.totalorder %s2567_s28, 3 }
  0x10   : > { %p399_p9 = pnand %p2047_p7, %p398_p8 }
  0x11   : > { %v2453_v0 = vld [vmem:[%s3058_s2] sm:$0xff] (!%p399_p9)   ;;  %v2569_v1 = vmov (!%p399_p9), 0.0   ;;  %v2454_v2 = vld [vmem:[%s3058_s2 + $0x8] sm:$0xff] (!%p399_p9)   ;;  %vm2570_vm0 = vmmov (!%p399_p9), 0   ;;  %p445_p10 = scmp.lt.s32.totalorder (!%p399_p9), %s2666_s29, 1  ;;  %s3077_s0 = sld [smem:[#allocation8_spill]] (!%p399_p9) }
  0x12   : > { %402 = sbr.rel (%p399_p9) target bundleno = 4704 (0x1260), region = 72  ;;  %2237 = vmatprep.subr.bf16.mxu1 (!%p399_p9), %v2569_v1  ;;  %2253 = vmatprep.subr.bf16.mxu0 (!%p399_p9), %v2569_v1  ;;  %s3078_s1 = sld [smem:[#allocation9_spill]] (!%p399_p9)  ;;  %vm482_vm1 = vcmask (!%p399_p9), 261120   ;;  %v2455_v5 = vld [vmem:[%s3059_s3] sm:$0xff] (!%p399_p9)   ;;  %v2456_v8 = vld [vmem:[%s3059_s3 + $0x8] sm:$0xff] (!%p399_p9)   ;;  %vm657_vm2 = vcmask (!%p399_p9), 64512  }
  0x13   : > { %2238 = vmatpush3.bf16.msra.mxu1 (!%p399_p9), %v2453_v0  ;;  %2241 = vmatprep.mubr.msk.bf16.mxu1 (!%p399_p9), %vm2570_vm0, %v2569_v1  ;;  %v2055_v13 = vld [vmem:[%s3062_s6] ss:$0 sm:$0xff] (!%p399_p9)  ;;  %v2458_v25 = vld [vmem:[%s3060_s4 + $0x8] sm:$0xff] (!%p399_p9)   ;;  %vm720_vm3 = vcmask (!%p399_p9), 1043456   ;;  %v2461_v45 = vld [vmem:[%s3058_s2 + $0x10] sm:$0xff] (!%p399_p9)   ;;  %vm1071_vm4 = vcmask (!%p399_p9), 130112  }
  0x14   : > { %2239 = vmatprep.subr.bf16.mxu1 (!%p399_p9), %v2569_v1  ;;  %2257 = vmatprep.mubr.msk.bf16.mxu0 (!%p399_p9), %vm2570_vm0, %v2569_v1  ;;  %v2051_v20 = vld [vmem:[%s3061_s5] ss:$0 sm:$0xff] (!%p399_p9)  ;;  %v2462_v46 = vld [vmem:[%s3058_s2 + $0x18] sm:$0xff] (!%p399_p9)   ;;  %v2459_v50 = vld [vmem:[%s3059_s3 + $0x10] sm:$0xff] (!%p399_p9)   ;;  %s2572_s16 = smov (!%p399_p9), 16   ;;  %vm1379_vm5 = vcmask (!%p399_p9), 195712  }
  0x15   : > { %v2457_v24 = vld [vmem:[%s3060_s4] sm:$0xff] (!%p399_p9)   ;;  %v2460_v52 = vld [vmem:[%s3059_s3 + $0x18] sm:$0xff] (!%p399_p9)   ;;  %s2573_s27 = smov (!%p399_p9), 24   ;;  %vm1687_vm6 = vcmask (!%p399_p9), 261312   ;;  %vm1890_vm7 = vcmask (!%p399_p9), 523264   ;;  %s2171_s15 = sshll.u32 (!%p399_p9), %s2666_s29, 7 }
  0x16   : > { %2254 = vmatpush3.bf16.msra.mxu0 (!%p399_p9), %v2457_v24  ;;  %v2059_v32 = vld [vmem:[%s3063_s7] ss:$0 sm:$0xff] (!%p399_p9)  ;;  %v2079_v61 = vld [vmem:[%s3062_s6 + $0x1] ss:$0 sm:$0xff] (!%p399_p9) }
  0x17   : > { %2240 = vmatpush3.bf16.msra.mxu1 (!%p399_p9), %v2454_v2  ;;  %2255 = vmatprep.subr.bf16.mxu0 (!%p399_p9), %v2569_v1 }
  0x18   : > { %2245 = vmatprep.subr.bf16.mxu1 (!%p399_p9), %v2569_v1 }
  0x19   : > { %s446_s24 = scalar_select %p445_p10, %s2666_s29, 1 }
  0x1a   : > { %2256 = vmatpush3.bf16.msra.mxu0 %v2458_v25  ;;  %s2574_s29 = smov [#allocation3]  }
  0x1b   : > { %s2049_s30 = sshll.u32 %s446_s24, 3  ;;  %2267 = vmatprep.subr.bf16.mxu0 %v2569_v1 }
  0x1c   : > { %s448_s20 = scalar_lea.vmem %s3077_s0, %s2049_s30  ;;  %s452_s23 = scalar_lea.vmem %s3078_s1, %s2049_s30 }
  0x1d   : > { %v2715_v3 = vld [vmem:[%s448_s20] sm:$0xff]  ;;  %s2571_s30 = smov 8   ;;  %s3013_s1 = scalar_lea.hbm %s3069_s13, %s2171_s15 }
  0x1e   : > { %v455_v4 = vld [vmem:[%s452_s23] sm:$0xff]  ;;  %v2756_v26 = vpack.c.bf16 %v2715_v3, %v2715_v3 }
  0x1f   : > { %v456_v6 = vadd.f32 %v455_v4, %v2715_v3  ;;  %v2070_v4 = vld [vmem:[%s3061_s5 + $0x1] ss:$0 sm:$0xff] }
  0x20   : > { %2258 = vmatmul.mubr.msk.bf16.vlgmr.msra.gmra.mrb[0].mxu0 %vm482_vm1, %v2756_v26 }
  0x21   : > { %v2721_v7 = vpack.c.bf16 %v456_v6, %v456_v6  ;;  %2269 = vmatprep.mubr.msk.bf16.mxu0 %vm2570_vm0, %v2569_v1 }
  0x23   : > { %2242 = vmatmul.mubr.msk.bf16.vlgmr.msra.gmra.mrb[0].mxu1 %vm482_vm1, %v2721_v7 }
  0x24   : > { %2246 = vmatpush3.bf16.msra.mxu1 %v2455_v5  ;;  %2249 = vmatprep.mubr.msk.bf16.mxu1 %vm2570_vm0, %v2569_v1 }
  0x25   : > { %2247 = vmatprep.subr.bf16.mxu1 %v2569_v1 }
  0x28   : > { %2248 = vmatpush3.bf16.msra.mxu1 %v2456_v8 }
  0x29   : > { %2261 = vmatprep.subr.bf16.mxu1 %v2569_v1 }
  0x2b   : > { %2250 = vmatmul.mubr.msk.bf16.vlgmr.msra.gmra.mrb[4].mxu1 %vm482_vm1, %v2721_v7 }
  0x2c   : > { %2263 = vmatprep.mubr.msk.bf16.mxu1 %vm2570_vm0, %v2569_v1 }
  0xf3   : > { %v649_v33 = vpop.f32.mrb[0].mxu0 }
  0xf4   : > { %v650_v34 = vadd.f32 %v2059_v32, %v649_v33  ;;  %v2259_v35 = vpop.f32.mrb[1].mxu0  ;;  %v2467_v32 = vld [vmem:[%s3058_s2 + $0x20] sm:$0xff]   ;;  %v2468_v33 = vld [vmem:[%s3058_s2 + $0x28] sm:$0xff]  }
  0xf5   : > { %v652_v36 = vpop.f32.mrb[2].mxu0 }
  0xf6   : > { %v520_v9 = vpop.f32.mrb[0].mxu1  ;;  %v716_v37 = vpack.c.bf16 %v650_v34, %v650_v34  ;;  %v2260_v38 = vpop.f32.mrb[3].mxu0 }
  0xf7   : > { %v2243_v10 = vpop.f32.mrb[1].mxu1  ;;  %v521_v22 = vadd.f32 %v2051_v20, %v520_v9 }
  0xf8   : > { %v523_v11 = vpop.f32.mrb[2].mxu1  ;;  %v722_v39 = vsel %vm720_vm3, %v716_v37, 0  ;;  %v2465_v37 = vld [vmem:[%s3059_s3 + $0x20] sm:$0xff]  }
  0xf9   : > { %v2244_v12 = vpop.f32.mrb[3].mxu1  ;;  %v655_v23 = vpack.c.bf16 %v521_v22, %v521_v22  ;;  %2268 = vmatpush3.bf16.msra.mxu0 %v722_v39  ;;  %v2463_v11 = vld [vmem:[%s3060_s4 + $0x10] sm:$0xff]   ;;  %v2466_v39 = vld [vmem:[%s3059_s3 + $0x28] sm:$0xff]  }
  0xfa   : > { %2281 = vmatprep.subr.bf16.mxu0 %v2569_v1  ;;  %v2464_v12 = vld [vmem:[%s3060_s4 + $0x18] sm:$0xff]  }
  0xfe   : > { %v583_v14 = vpop.f32.mrb[4].mxu1 }
  0xff   : > { %v584_v15 = vadd.f32 %v2055_v13, %v583_v14  ;;  %v2251_v16 = vpop.f32.mrb[5].mxu1 }
 0x100   : > { %v586_v17 = vpop.f32.mrb[6].mxu1 }
 0x101   : > { %v656_v18 = vpack.c.bf16 %v584_v15, %v584_v15  ;;  %v2252_v19 = vpop.f32.mrb[7].mxu1 }
 0x103   : > { %v662_v21 = vsel %vm657_vm2, %v656_v18, 0 }
 0x104   : > { %2262 = vmatpush3.bf16.xpose.msra.mxu1 %v662_v21 }
 0x105   : > { %2273 = vmatprep.subr.bf16.mxu1 %v2569_v1 }
 0x10b   : > { %2264 = vmatmul.mubr.msk.bf16.vlgmr.msra.gmra.mrb[8].mxu1 %vm657_vm2, %v655_v23 }
 0x10c   : > { %2277 = vmatprep.mubr.msk.bf16.mxu1 %vm2570_vm0, %v2569_v1  ;;  %2274 = vmatpush3.bf16.msra.mxu1 %v2461_v45 }
 0x10d   : > { %2275 = vmatprep.subr.bf16.mxu1 %v2569_v1 }
 0x110   : > { %2276 = vmatpush3.bf16.msra.mxu1 %v2462_v46 }
 0x111   : > { %2289 = vmatprep.subr.bf16.mxu1 %v2569_v1 }
 0x113   : > { %2278 = vmatmul.mubr.msk.bf16.vlgmr.msra.gmra.mrb[12].mxu1 %vm482_vm1, %v2721_v7 }
 0x114   : > { %2293 = vmatprep.mubr.msk.bf16.mxu1 %vm2570_vm0, %v2569_v1  ;;  %2290 = vmatpush3.bf16.msra.mxu1 %v2463_v11 }
 0x115   : > { %2291 = vmatprep.subr.bf16.mxu1 %v2569_v1 }
 0x118   : > { %2292 = vmatpush3.bf16.msra.mxu1 %v2464_v12 }
 0x119   : > { %2303 = vmatprep.subr.bf16.mxu1 %v2569_v1 }
 0x11b   : > { %2294 = vmatmul.mubr.msk.bf16.vlgmr.msra.gmra.mrb[16].mxu1 %vm482_vm1, %v2756_v26 }
 0x11c   : > { %2305 = vmatprep.mubr.msk.bf16.mxu1 %vm2570_vm0, %v2569_v1 }
 0x1de   : > { %v698_v27 = vpop.f32.mrb[8].mxu1 }
 0x1df   : > { %v2265_v28 = vpop.f32.mrb[9].mxu1  ;;  %v704_v29 = vsel %vm657_vm2, %v698_v27, -inf }
 0x1e0   : > { %705 = vmax.xlane.f32.xlu0 %v704_v29  ;;  %v701_v30 = vpop.f32.mrb[10].mxu1 }
 0x1e1   : > { %v2266_v31 = vpop.f32.mrb[11].mxu1 }
 0x1e6   : > { %v824_v53 = vpop.f32.mrb[12].mxu1 }
 0x1e7   : > { %v2279_v54 = vpop.f32.mrb[13].mxu1  ;;  %v825_v9 = vadd.f32 %v2070_v4, %v824_v53  ;;  %v2099_v53 = vld [vmem:[%s3061_s5 + $0x2] ss:$0 sm:$0xff] }
 0x1e8   : > { %v827_v55 = vpop.f32.mrb[14].mxu1  ;;  %v2117_v4 = vld [vmem:[%s3063_s7 + $0x2] ss:$0 sm:$0xff] }
 0x1e9   : > { %v2280_v56 = vpop.f32.mrb[15].mxu1  ;;  %v960_v10 = vpack.c.bf16 %v825_v9, %v825_v9 }
 0x1ee   : > { %v954_v23 = vpop.f32.mrb[16].mxu1 }
 0x1ef   : > { %v2295_v24 = vpop.f32.mrb[17].mxu1 }
 0x1f0   : > { %v957_v25 = vpop.f32.mrb[18].mxu1 }
 0x1f1   : > { %v2296_v28 = vpop.f32.mrb[19].mxu1  ;;  %v2472_v25 = vld [vmem:[%s3059_s3 + $0x38] sm:$0xff]  }
 0x26d   : > { %v706_v40 = vpop.xlane.xlu0 %705 }
 0x26e   : > { %v707_v41 = vsub.f32 %v698_v27, %v706_v40  ;;  %v2088_v27 = vld [vmem:[%s3063_s7 + $0x1] ss:$0 sm:$0xff] }
 0x26f   : > { %v955_v29 = vadd.f32 %v2088_v27, %v954_v23  ;;  %v2471_v23 = vld [vmem:[%s3059_s3 + $0x30] sm:$0xff]  }
 0x270   : > { %v708_v42 = vmul.f32 1.442695, %v707_v41 }
 0x271   : > { %v1020_v30 = vpack.c.bf16 %v955_v29, %v955_v29 }
 0x272   : > { %2485 = vpow2.f32 %v708_v42 }
 0x273   : > { %v1025_v31 = vsel %vm720_vm3, %v1020_v30, 0 }
 0x274   : > { %2304 = vmatpush3.bf16.msra.mxu1 %v1025_v31 }
 0x275   : > { %2317 = vmatprep.subr.bf16.mxu1 %v2569_v1 }
 0x27c   : > { %v2486_v43 = vpop.eup %2485 }
 0x27d   : > { %v710_v44 = vsel %vm657_vm2, %v2486_v43, 0.0 }
 0x27e   : > { %711 = vadd.xlane.f32.xlu0 %v710_v44 }
 0x30b   : > { %v712_v47 = vpop.xlane.xlu0 %711 }
 0x30c   : > { %2487 = vrcp.f32 %v712_v47 }
 0x316   : > { %v2488_v48 = vpop.eup %2487 }
 0x317   : > { %v714_v49 = vmul.f32 %v2488_v48, %v2486_v43  ;;  %v2108_v48 = vld [vmem:[%s3062_s6 + $0x2] ss:$0 sm:$0xff] }
 0x319   : > { %v715_v51 = vpack.c.bf16 %v714_v49, %v714_v49 }
 0x31b   : > { %2270 = vmatmul.mubr.msk.bf16.vlgmr.msra.gmra.mrb[4].mxu0 %vm657_vm2, %v715_v51 }
 0x31c   : > { %2282 = vmatpush3.bf16.msra.mxu0 %v2459_v50  ;;  %2285 = vmatprep.mubr.msk.bf16.mxu0 %vm2570_vm0, %v2569_v1 }
 0x31d   : > { %2283 = vmatprep.subr.bf16.mxu0 %v2569_v1 }
 0x320   : > { %2284 = vmatpush3.bf16.msra.mxu0 %v2460_v52 }
 0x321   : > { %2297 = vmatprep.subr.bf16.mxu0 %v2569_v1 }
 0x323   : > { %2286 = vmatmul.mubr.msk.bf16.vlgmr.msra.gmra.mrb[8].mxu0 %vm482_vm1, %v2721_v7 }
 0x324   : > { %2299 = vmatprep.mubr.msk.bf16.mxu0 %vm2570_vm0, %v2569_v1 }
 0x3ee   : > { %v758_v57 = vpop.f32.mrb[4].mxu0 }
 0x3ef   : > { %764 = vst.msk [vmem:[#allocation2] sm:$0xff] %vm657_vm2, %v758_v57  ;;  %v2271_v58 = vpop.f32.mrb[5].mxu0 }
 0x3f0   : > { %v761_v59 = vpop.f32.mrb[6].mxu0 }
 0x3f1   : > { %v2272_v60 = vpop.f32.mrb[7].mxu0  ;;  %v2469_v59 = vld [vmem:[%s3060_s4 + $0x20] sm:$0xff]  }
 0x3f2   : > { %v2470_v60 = vld [vmem:[%s3060_s4 + $0x28] sm:$0xff]  }
 0x3f6   : > { %v889_v62 = vpop.f32.mrb[8].mxu0 }
 0x3f7   : > { %v890_v63 = vadd.f32 %v2079_v61, %v889_v62  ;;  %v2287_v0 = vpop.f32.mrb[9].mxu0 }
 0x3f8   : > { %v892_v2 = vpop.f32.mrb[10].mxu0 }
 0x3f9   : > { %v961_v5 = vpack.c.bf16 %v890_v63, %v890_v63  ;;  %v2288_v6 = vpop.f32.mrb[11].mxu0 }
 0x3fb   : > { %v966_v8 = vsel %vm657_vm2, %v961_v5, 0 }
 0x3fc   : > { %2298 = vmatpush3.bf16.xpose.msra.mxu0 %v966_v8 }
 0x3fd   : > { %2309 = vmatprep.subr.bf16.mxu0 %v2569_v1 }
 0x403   : > { %2300 = vmatmul.mubr.msk.bf16.vlgmr.msra.gmra.mrb[12].mxu0 %vm657_vm2, %v960_v10 }
 0x404   : > { %2313 = vmatprep.mubr.msk.bf16.mxu0 %vm2570_vm0, %v2569_v1  ;;  %2310 = vmatpush3.bf16.msra.mxu0 %v2467_v32 }
 0x405   : > { %2311 = vmatprep.subr.bf16.mxu0 %v2569_v1 }
 0x408   : > { %2312 = vmatpush3.bf16.msra.mxu0 %v2468_v33 }
 0x409   : > { %2325 = vmatprep.subr.bf16.mxu0 %v2569_v1 }
 0x40b   : > { %2314 = vmatmul.mubr.msk.bf16.vlgmr.msra.gmra.mrb[16].mxu0 %vm482_vm1, %v2721_v7 }
 0x40c   : > { %2329 = vmatprep.mubr.msk.bf16.mxu0 %vm2570_vm0, %v2569_v1  ;;  %2326 = vmatpush3.bf16.msra.mxu0 %v2469_v59 }
 0x40d   : > { %2327 = vmatprep.subr.bf16.mxu0 %v2569_v1 }
 0x410   : > { %2328 = vmatpush3.bf16.msra.mxu0 %v2470_v60 }
 0x411   : > { %2339 = vmatprep.subr.bf16.mxu0 %v2569_v1 }
 0x413   : > { %2330 = vmatmul.mubr.msk.bf16.vlgmr.msra.gmra.mrb[20].mxu0 %vm482_vm1, %v2756_v26 }
 0x414   : > { %2341 = vmatprep.mubr.msk.bf16.mxu0 %vm2570_vm0, %v2569_v1 }
 0x4d6   : > { %v1002_v13 = vpop.f32.mrb[12].mxu0 }
 0x4d7   : > { %v2301_v14 = vpop.f32.mrb[13].mxu0  ;;  %v1008_v15 = vsel %vm657_vm2, %v1002_v13, -inf }
 0x4d8   : > { %1009 = vmax.xlane.f32.xlu1 %v1008_v15  ;;  %v1005_v16 = vpop.f32.mrb[14].mxu0 }
 0x4d9   : > { %v2302_v17 = vpop.f32.mrb[15].mxu0 }
 0x4de   : > { %v1132_v40 = vpop.f32.mrb[16].mxu0 }
 0x4df   : > { %v2315_v41 = vpop.f32.mrb[17].mxu0  ;;  %v1133_v57 = vadd.f32 %v2099_v53, %v1132_v40 }
 0x4e0   : > { %v1135_v42 = vpop.f32.mrb[18].mxu0 }
 0x4e1   : > { %v2316_v43 = vpop.f32.mrb[19].mxu0  ;;  %v1268_v58 = vpack.c.bf16 %v1133_v57, %v1133_v57 }
 0x4e6   : > { %v1262_v5 = vpop.f32.mrb[20].mxu0 }
 0x4e7   : > { %v1263_v6 = vadd.f32 %v2117_v4, %v1262_v5  ;;  %v2331_v8 = vpop.f32.mrb[21].mxu0 }
 0x4e8   : > { %v1265_v9 = vpop.f32.mrb[22].mxu0 }
 0x4e9   : > { %v1328_v10 = vpack.c.bf16 %v1263_v6, %v1263_v6  ;;  %v2332_v11 = vpop.f32.mrb[23].mxu0  ;;  %v2477_v9 = vld [vmem:[%s3064_s8] sm:$0xff]  }
 0x4eb   : > { %v1333_v12 = vsel %vm720_vm3, %v1328_v10, 0  ;;  %v2478_v10 = vld [vmem:[%s3064_s8 + $0x8] sm:$0xff]  }
 0x4ec   : > { %2340 = vmatpush3.bf16.msra.mxu0 %v1333_v12 }
 0x4ed   : > { %2353 = vmatprep.subr.bf16.mxu0 %v2569_v1 }
 0x565   : > { %v1010_v18 = vpop.xlane.xlu1 %1009 }
 0x566   : > { %v1011_v19 = vsub.f32 %v1002_v13, %v1010_v18  ;;  %v2473_v18 = vld [vmem:[%s3058_s2 + $0x30] sm:$0xff]  }
 0x568   : > { %v1012_v20 = vmul.f32 1.442695, %v1011_v19  ;;  %v2474_v19 = vld [vmem:[%s3058_s2 + $0x38] sm:$0xff]  }
 0x56a   : > { %2489 = vpow2.f32 %v1012_v20 }
 0x574   : > { %v2490_v21 = vpop.eup %2489 }
 0x575   : > { %v1014_v22 = vsel %vm657_vm2, %v2490_v21, 0.0 }
 0x576   : > { %1015 = vadd.xlane.f32.xlu1 %v1014_v22 }
 0x603   : > { %v1016_v34 = vpop.xlane.xlu1 %1015 }
 0x604   : > { %2491 = vrcp.f32 %v1016_v34 }
 0x60e   : > { %v2492_v35 = vpop.eup %2491 }
 0x60f   : > { %v1018_v36 = vmul.f32 %v2492_v35, %v2490_v21  ;;  %v2137_v35 = vld [vmem:[%s3062_s6 + $0x3] ss:$0 sm:$0xff] }
 0x611   : > { %v1019_v38 = vpack.c.bf16 %v1018_v36, %v1018_v36 }
 0x613   : > { %2306 = vmatmul.mubr.msk.bf16.vlgmr.msra.gmra.mrb[20].mxu1 %vm657_vm2, %v1019_v38 }
 0x614   : > { %2318 = vmatpush3.bf16.msra.mxu1 %v2465_v37  ;;  %2321 = vmatprep.mubr.msk.bf16.mxu1 %vm2570_vm0, %v2569_v1 }
 0x615   : > { %2319 = vmatprep.subr.bf16.mxu1 %v2569_v1 }
 0x618   : > { %2320 = vmatpush3.bf16.msra.mxu1 %v2466_v39 }
 0x619   : > { %2333 = vmatprep.subr.bf16.mxu1 %v2569_v1 }
 0x61b   : > { %2322 = vmatmul.mubr.msk.bf16.vlgmr.msra.gmra.mrb[24].mxu1 %vm482_vm1, %v2721_v7 }
 0x61c   : > { %2335 = vmatprep.mubr.msk.bf16.mxu1 %vm2570_vm0, %v2569_v1 }
 0x6e6   : > { %v2855_v44 = vpop.f32.mrb[20].mxu1 }
 0x6e7   : > { %v2307_v45 = vpop.f32.mrb[21].mxu1 }
 0x6e8   : > { %v1064_v46 = vpop.f32.mrb[22].mxu1 }
 0x6e9   : > { %v2308_v47 = vpop.f32.mrb[23].mxu1  ;;  %v2475_v46 = vld [vmem:[%s3060_s4 + $0x30] sm:$0xff]  }
 0x6ea   : > { %v2476_v47 = vld [vmem:[%s3060_s4 + $0x38] sm:$0xff]  }
 0x6ee   : > { %v1197_v49 = vpop.f32.mrb[24].mxu1 }
 0x6ef   : > { %v1198_v50 = vadd.f32 %v2108_v48, %v1197_v49  ;;  %v2323_v51 = vpop.f32.mrb[25].mxu1 }
 0x6f0   : > { %v1200_v52 = vpop.f32.mrb[26].mxu1 }
 0x6f1   : > { %v1269_v54 = vpack.c.bf16 %v1198_v50, %v1198_v50  ;;  %v2324_v55 = vpop.f32.mrb[27].mxu1 }
 0x6f3   : > { %v1274_v56 = vsel %vm657_vm2, %v1269_v54, 0 }
 0x6f4   : > { %2334 = vmatpush3.bf16.xpose.msra.mxu1 %v1274_v56 }
 0x6f5   : > { %2345 = vmatprep.subr.bf16.mxu1 %v2569_v1 }
 0x6fb   : > { %2336 = vmatmul.mubr.msk.bf16.vlgmr.msra.gmra.mrb[28].mxu1 %vm657_vm2, %v1268_v58 }
 0x6fc   : > { %2349 = vmatprep.mubr.msk.bf16.mxu1 %vm2570_vm0, %v2569_v1  ;;  %2346 = vmatpush3.bf16.msra.mxu1 %v2473_v18  ;;  %v2152_v18 = vld [vmem:[%s3068_s12] ss:$0 sm:$0xff] }
 0x6fd   : > { %2347 = vmatprep.subr.bf16.mxu1 %v2569_v1 }
 0x700   : > { %2348 = vmatpush3.bf16.msra.mxu1 %v2474_v19 }
 0x701   : > { %2361 = vmatprep.subr.bf16.mxu1 %v2569_v1 }
 0x703   : > { %2350 = vmatmul.mubr.msk.bf16.vlgmr.msra.gmra.mrb[32].mxu1 %vm482_vm1, %v2721_v7 }
 0x704   : > { %2365 = vmatprep.mubr.msk.bf16.mxu1 %vm2570_vm0, %v2569_v1  ;;  %2362 = vmatpush3.bf16.msra.mxu1 %v2475_v46  ;;  %v2484_v46 = vld [vmem:[%s3067_s11 + $0x18] sm:$0xff]  }
 0x705   : > { %2363 = vmatprep.subr.bf16.mxu1 %v2569_v1 }
 0x708   : > { %2364 = vmatpush3.bf16.msra.mxu1 %v2476_v47  ;;  %v2158_v47 = vld [vmem:[%s3066_s10] ss:$0 sm:$0xff] }
 0x709   : > { %2375 = vmatprep.subr.bf16.mxu1 %v2569_v1 }
 0x70b   : > { %2366 = vmatmul.mubr.msk.bf16.vlgmr.msra.gmra.mrb[36].mxu1 %vm482_vm1, %v2756_v26 }
 0x70c   : > { %2377 = vmatprep.mubr.msk.bf16.mxu1 %vm2570_vm0, %v2569_v1 }
 0x7ce   : > { %v1310_v61 = vpop.f32.mrb[28].mxu1 }
 0x7cf   : > { %v2337_v62 = vpop.f32.mrb[29].mxu1  ;;  %v1316_v63 = vsel %vm657_vm2, %v1310_v61, -inf }
 0x7d0   : > { %1317 = vmax.xlane.f32.xlu0 %v1316_v63  ;;  %v1313_v0 = vpop.f32.mrb[30].mxu1 }
 0x7d1   : > { %v2338_v2 = vpop.f32.mrb[31].mxu1 }
 0x7d6   : > { %v1440_v27 = vpop.f32.mrb[32].mxu1 }
 0x7d7   : > { %v2351_v28 = vpop.f32.mrb[33].mxu1 }
 0x7d8   : > { %v1443_v29 = vpop.f32.mrb[34].mxu1 }
 0x7d9   : > { %v2352_v30 = vpop.f32.mrb[35].mxu1 }
 0x7de   : > { %v1570_v58 = vpop.f32.mrb[36].mxu1 }
 0x7df   : > { %v2367_v59 = vpop.f32.mrb[37].mxu1 }
 0x7e0   : > { %v1573_v60 = vpop.f32.mrb[38].mxu1 }
 0x85d   : > { %v1318_v13 = vpop.xlane.xlu0 %1317 }
 0x85e   : > { %v1319_v14 = vsub.f32 %v1310_v61, %v1318_v13  ;;  %v2368_v61 = vpop.f32.mrb[39].mxu1 }
 0x860   : > { %v1320_v15 = vmul.f32 1.442695, %v1319_v14 }
 0x862   : > { %2493 = vpow2.f32 %v1320_v15 }
 0x86c   : > { %v2494_v16 = vpop.eup %2493 }
 0x86d   : > { %v1322_v17 = vsel %vm657_vm2, %v2494_v16, 0.0 }
 0x86e   : > { %1323 = vadd.xlane.f32.xlu1 %v1322_v17 }
 0x8fb   : > { %v1324_v20 = vpop.xlane.xlu1 %1323 }
 0x8fc   : > { %2495 = vrcp.f32 %v1324_v20 }
 0x906   : > { %v2496_v21 = vpop.eup %2495 }
 0x907   : > { %v1326_v22 = vmul.f32 %v2496_v21, %v2494_v16 }
 0x909   : > { %v1327_v24 = vpack.c.bf16 %v1326_v22, %v1326_v22 }
 0x90b   : > { %2342 = vmatmul.mubr.msk.bf16.vlgmr.msra.gmra.mrb[24].mxu0 %vm657_vm2, %v1327_v24 }
 0x90c   : > { %2354 = vmatpush3.bf16.msra.mxu0 %v2471_v23  ;;  %2357 = vmatprep.mubr.msk.bf16.mxu0 %vm2570_vm0, %v2569_v1 }
 0x90d   : > { %2355 = vmatprep.subr.bf16.mxu0 %v2569_v1 }
 0x910   : > { %2356 = vmatpush3.bf16.msra.mxu0 %v2472_v25 }
 0x911   : > { %2369 = vmatprep.subr.bf16.mxu0 %v2569_v1 }
 0x913   : > { %2358 = vmatmul.mubr.msk.bf16.vlgmr.msra.gmra.mrb[28].mxu0 %vm482_vm1, %v2721_v7  ;;  %v2128_v7 = vld [vmem:[%s3061_s5 + $0x3] ss:$0 sm:$0xff] }
 0x914   : > { %2371 = vmatprep.mubr.msk.bf16.mxu0 %vm2570_vm0, %v2569_v1  ;;  %v1441_v43 = vadd.f32 %v2128_v7, %v1440_v27 }
 0x916   : > { %v1576_v45 = vpack.c.bf16 %v1441_v43, %v1441_v43 }
 0x9de   : > { %v1369_v31 = vpop.f32.mrb[24].mxu0 }
 0x9df   : > { %v2343_v32 = vpop.f32.mrb[25].mxu0 }
 0x9e0   : > { %v1372_v33 = vpop.f32.mrb[26].mxu0  ;;  %v2479_v32 = vld [vmem:[%s3065_s9] sm:$0xff]  }
 0x9e1   : > { %v2344_v34 = vpop.f32.mrb[27].mxu0  ;;  %v2481_v33 = vld [vmem:[%s3067_s11] sm:$0xff]  }
 0x9e2   : > { %v2482_v34 = vld [vmem:[%s3067_s11 + $0x8] sm:$0xff]  }
 0x9e6   : > { %v1505_v36 = vpop.f32.mrb[28].mxu0 }
 0x9e7   : > { %v1506_v37 = vadd.f32 %v2137_v35, %v1505_v36  ;;  %v2359_v38 = vpop.f32.mrb[29].mxu0 }
 0x9e8   : > { %v1508_v39 = vpop.f32.mrb[30].mxu0 }
 0x9e9   : > { %v1577_v40 = vpack.c.bf16 %v1506_v37, %v1506_v37  ;;  %v2360_v41 = vpop.f32.mrb[31].mxu0  ;;  %v2156_v39 = vld [vmem:[%s3068_s12 + $0x1] ss:$0 sm:$0xff] }
 0x9eb   : > { %v1582_v42 = vsel %vm657_vm2, %v1577_v40, 0  ;;  %v2157_v40 = vld [vmem:[%s3068_s12 + $0x2] ss:$0 sm:$0xff] }
 0x9ec   : > { %2370 = vmatpush3.bf16.xpose.msra.mxu0 %v1582_v42 }
 0x9ed   : > { %2381 = vmatprep.subr.bf16.mxu0 %v2569_v1 }
 0x9f3   : > { %2372 = vmatmul.mubr.msk.bf16.vlgmr.msra.gmra.mrb[32].mxu0 %vm657_vm2, %v1576_v45  ;;  %v2483_v45 = vld [vmem:[%s3067_s11 + $0x10] sm:$0xff]  }
 0x9f4   : > { %2385 = vmatprep.mubr.msk.bf16.mxu0 %vm2570_vm0, %v2569_v1  ;;  %2382 = vmatpush3.bf16.msra.mxu0 %v2477_v9 }
 0x9f5   : > { %2383 = vmatprep.subr.bf16.mxu0 %v2569_v1 }
 0x9f8   : > { %2384 = vmatpush3.bf16.msra.mxu0 %v2478_v10  ;;  %v2169_v10 = vld [vmem:[%s3068_s12 + $0x5] ss:$0 sm:$0xff] }
 0x9f9   : > { %2397 = vmatprep.subr.bf16.mxu0 %v2569_v1 }
 0xac6   : > { %v1618_v48 = vpop.f32.mrb[32].mxu0 }
 0xac7   : > { %v2373_v49 = vpop.f32.mrb[33].mxu0  ;;  %v1624_v50 = vsel %vm657_vm2, %v1618_v48, -inf }
 0xac8   : > { %1625 = vmax.xlane.f32.xlu0 %v1624_v50  ;;  %v1621_v51 = vpop.f32.mrb[34].mxu0 }
 0xac9   : > { %v2374_v52 = vpop.f32.mrb[35].mxu0 }
 0xade   : > { %1068 = vrot.lane.b32.xlu0 %v2855_v44, %s2571_s30  ;;  %v2146_v44 = vld [vmem:[%s3063_s7 + $0x3] ss:$0 sm:$0xff] }
 0xadf   : > { %v1571_v62 = vadd.f32 %v2146_v44, %v1570_v58 }
 0xae1   : > { %v1636_v63 = vpack.c.bf16 %v1571_v62, %v1571_v62 }
 0xae3   : > { %v1641_v0 = vsel %vm720_vm3, %v1636_v63, 0 }
 0xae4   : > { %2376 = vmatpush3.bf16.msra.mxu1 %v1641_v0 }
 0xae5   : > { %2389 = vmatprep.subr.bf16.mxu1 %v2569_v1 }
 0xb55   : > { %v1626_v53 = vpop.xlane.xlu0 %1625 }
 0xb56   : > { %v1627_v54 = vsub.f32 %v1618_v48, %v1626_v53 }
 0xb58   : > { %v1628_v55 = vmul.f32 1.442695, %v1627_v54 }
 0xb59   : > { %v1069_v56 = vpop.permute.xlu0 %1068 }
 0xb5a   : > { %2497 = vpow2.f32 %v1628_v55  ;;  %1072 = vst.msk [vmem:[#allocation2] sm:$0xff] %vm1071_vm4, %v1069_v56 }
 0xb64   : > { %v2498_v26 = vpop.eup %2497 }
 0xb65   : > { %v1630_v57 = vsel %vm657_vm2, %v2498_v26, 0.0 }
 0xb66   : > { %1631 = vadd.xlane.f32.xlu1 %v1630_v57 }
 0xb77   : > { %1376 = vrot.lane.b32.xlu1 %v1369_v31, %s2572_s16  ;;  %s442_s16 = sand.u32 1, %s2559_s26  }
 0xb78   : > { %s2048_s20 = sshll.u32 %s442_s16, 3  ;;  %s1960_s21 = scalar_lea.sflag [#allocation4], %s442_s16 }
 0xbf3   : > { %v1632_v2 = vpop.xlane.xlu1 %1631 }
 0xbf4   : > { %2499 = vrcp.f32 %v1632_v2 }
 0xbf7   : > { %v1377_v4 = vpop.permute.xlu1 %1376 }
 0xbf8   : > { %1380 = vst.msk [vmem:[#allocation2] sm:$0xff] %vm1379_vm5, %v1377_v4 }
 0xbfe   : > { %v2500_v5 = vpop.eup %2499 }
 0xbff   : > { %v1634_v6 = vmul.f32 %v2500_v5, %v2498_v26 }
 0xc01   : > { %v1635_v8 = vpack.c.bf16 %v1634_v6, %v1634_v6 }
 0xc03   : > { %2378 = vmatmul.mubr.msk.bf16.vlgmr.msra.gmra.mrb[40].mxu1 %vm657_vm2, %v1635_v8  ;;  %v2168_v8 = vld [vmem:[%s3068_s12 + $0x4] ss:$0 sm:$0xff] }
 0xc04   : > { %2393 = vmatprep.mubr.msk.bf16.mxu1 %vm2570_vm0, %v2569_v1  ;;  %2390 = vmatpush3.bf16.msra.mxu1 %v2479_v32 }
 0xc05   : > { %2391 = vmatprep.subr.bf16.mxu1 %v2569_v1 }
 0xcd6   : > { %v1677_v11 = vpop.f32.mrb[40].mxu1 }
 0xcd7   : > { %1684 = vrot.lane.b32.xlu1 %v1677_v11, %s2573_s27  ;;  %v2379_v12 = vpop.f32.mrb[41].mxu1  ;;  %s444_s27 = scalar_lea.vmem [#allocation3], %s2048_s20  ;;  %s2509_s20 = sshll.u32 %s2574_s29, 4  ;;  %s2510_s20 = int_to_ptr.vmem [resolvable:$false] %s2509_s20 }
 0xcd8   : > { %v1680_v13 = vpop.f32.mrb[42].mxu1  ;;  %s1973_s17 = sshll.u32 %s444_s27, 4  ;;  %s2511_s23 = scalar_lea.vmem %s2510_s20, 256  ;;  %s3015_s17 = int_to_ptr.vmem [resolvable:$true] %s1973_s17 }
 0xcd9   : > { %v2380_v14 = vpop.f32.mrb[43].mxu1  ;;  %s2505_s22 = scalar_lea.vmem %s3015_s17, 128  ;;  %p2512_p0 = scmp.lt.s32.totalorder %s3015_s17, %s2510_s20 }
 0xcda   : > { %p2506_p11 = scmp.ne.s32.totalorder %s3015_s17, %s2505_s22  ;;  %p2513_p1 = scmp.lt.s32.totalorder %s2511_s23, %s2505_s22 }
 0xcdc   : > { %p2507_p12 = pnand %p2506_p11, %p2683_p5  ;;  %p2514_p2 = por %p2513_p1, %p2512_p0 }
 0xcde   : > { %p2508_p13 = pneg %p2507_p12 }
 0xce0   : > { %p2515_p3 = pnand %p2514_p2, %p2508_p13 }
 0xd49   : > { %v1685_v15 = vpop.permute.xlu1 %1684 }
 0xd4a   : > { %1688 = vst.msk [vmem:[#allocation2] sm:$0xff] %vm1687_vm6, %v1685_v15 }
 0xd51   : > { %v1695_v16 = vld [vmem:[#allocation2] sm:$0xff] }
 0xd52   : > { %v1696_v17 = vpack.c.bf16 %v1695_v16, %v1695_v16 }
 0xd54   : > { %2386 = vmatmul.mubr.msk.bf16.vlgmr.msra.gmra.mrb[36].mxu0 %vm482_vm1, %v1696_v17 }
 0xd55   : > { %2405 = vmatprep.mubr.msk.bf16.mxu0 %vm2570_vm0, %v2569_v1  ;;  %2398 = vmatpush3.bf16.msra.mxu0 %v2481_v33 }
 0xd56   : > { %2399 = vmatprep.subr.bf16.mxu0 %v2569_v1 }
 0xd59   : > { %2400 = vmatpush3.bf16.msra.mxu0 %v2482_v34 }
 0xd5a   : > { %2401 = vmatprep.subr.bf16.mxu0 %v2569_v1 }
 0xd5d   : > { %2402 = vmatpush3.bf16.msra.mxu0 %v2483_v45 }
 0xd5e   : > { %2403 = vmatprep.subr.bf16.mxu0 %v2569_v1  ;;  %v2162_v1 = vld [vmem:[%s3068_s12 + $0x3] ss:$0 sm:$0xff] }
 0xd61   : > { %2404 = vmatpush3.bf16.msra.mxu0 %v2484_v46 }
 0xe27   : > { %v1754_v19 = vpop.f32.mrb[36].mxu0 }
 0xe28   : > { %v1755_v20 = vadd.f32 %v2152_v18, %v1754_v19  ;;  %v2387_v21 = vpop.f32.mrb[37].mxu0 }
 0xe29   : > { %v1757_v22 = vpop.f32.mrb[38].mxu0 }
 0xe2a   : > { %v2388_v23 = vpop.f32.mrb[39].mxu0  ;;  %v1760_v24 = vadd.f32 %v1755_v20, %v2715_v3  ;;  %v2480_v3 = vld [vmem:[%s3065_s9 + $0x8] sm:$0xff]  }
 0xe2b   : > { %2392 = vmatpush3.bf16.msra.mxu1 %v2480_v3 }
 0xe2c   : > { %v1761_v25 = vsel %vm482_vm1, %v1760_v24, 0.0 }
 0xe2d   : > { %1762 = vadd.xlane.f32.xlu1 %v1761_v25 }
 0xeba   : > { %v1763_v27 = vpop.xlane.xlu1 %1762 }
 0xebb   : > { %v1765_v28 = vmul.f32 0.03125, %v1763_v27 }
 0xebd   : > { %v1766_v29 = vsub.f32 %v1760_v24, %v1765_v28 }
 0xebf   : > { %v1767_v30 = vmul.f32 %v1766_v29, %v1766_v29 }
 0xec1   : > { %v1768_v31 = vsel %vm482_vm1, %v1767_v30, 0.0 }
 0xec2   : > { %1769 = vadd.xlane.f32.xlu0 %v1768_v31 }
 0xf4f   : > { %v1770_v35 = vpop.xlane.xlu0 %1769 }
 0xf50   : > { %v1771_v36 = vmul.f32 0.03125, %v1770_v35 }
 0xf52   : > { %v1772_v37 = vadd.f32 1e-05, %v1771_v36 }
 0xf54   : > { %2501 = vrsqrt.f32 %v1772_v37 }
 0xf5e   : > { %v2502_v38 = vpop.eup %2501 }
 0xf5f   : > { %v1774_v7 = vmul.f32 %v2502_v38, %v1766_v29 }
 0xf61   : > { %v1779_v41 = vmul.f32 %v2156_v39, %v1774_v7 }
 0xf63   : > { %v1784_v42 = vadd.f32 %v2157_v40, %v1779_v41 }
 0xf65   : > { %v1785_v43 = vpack.c.bf16 %v1784_v42, %v1784_v42 }
 0xf67   : > { %2394 = vmatmul.mubr.msk.bf16.vlgmr.msra.gmra.mrb[44].mxu1 %vm482_vm1, %v1785_v43 }
0x103a   : > { %v1846_v48 = vpop.f32.mrb[44].mxu1 }
0x103b   : > { %v1847_v49 = vadd.f32 %v2158_v47, %v1846_v48  ;;  %v2395_v50 = vpop.f32.mrb[45].mxu1 }
0x103c   : > { %v1849_v51 = vpop.f32.mrb[46].mxu1 }
0x103d   : > { %v1852_v52 = vmax.f32 %v1847_v49, 0.0  ;;  %v2396_v53 = vpop.f32.mrb[47].mxu1 }
0x103f   : > { %v1853_v54 = vpack.c.bf16 %v1852_v52, %v1852_v52 }
0x1041   : > { %2406 = vmatmul.mubr.msk.bf16.vlgmr.msra.gmra.mrb[40].mxu0 %vm1890_vm7, %v1853_v54 }
0x1114   : > { %v1928_v55 = vpop.f32.mrb[40].mxu0 }
0x1115   : > { %v1929_v56 = vadd.f32 %v2162_v1, %v1928_v55  ;;  %v2407_v26 = vpop.f32.mrb[41].mxu0 }
0x1116   : > { %v1931_v57 = vpop.f32.mrb[42].mxu0 }
0x1117   : > { %v2408_v58 = vpop.f32.mrb[43].mxu0  ;;  %v1934_v59 = vadd.f32 %v1929_v56, %v1784_v42 }
0x1119   : > { %v1935_v60 = vsel %vm482_vm1, %v1934_v59, 0.0 }
0x111a   : > { %1936 = vadd.xlane.f32.xlu0 %v1935_v60 }
0x11a7   : > { %v1937_v44 = vpop.xlane.xlu0 %1936 }
0x11a8   : > { %v1938_v61 = vmul.f32 0.03125, %v1937_v44 }
0x11aa   : > { %v1939_v62 = vsub.f32 %v1934_v59, %v1938_v61 }
0x11ac   : > { %v1940_v63 = vmul.f32 %v1939_v62, %v1939_v62 }
0x11ae   : > { %v1941_v0 = vsel %vm482_vm1, %v1940_v63, 0.0 }
0x11af   : > { %1942 = vadd.xlane.f32.xlu0 %v1941_v0 }
0x123c   : > { %v1943_v2 = vpop.xlane.xlu0 %1942 }
0x123d   : > { %v1944_v4 = vmul.f32 0.03125, %v1943_v2 }
0x123f   : > { %v1945_v5 = vadd.f32 1e-05, %v1944_v4 }
0x1241   : > { %2503 = vrsqrt.f32 %v1945_v5 }
0x124b   : > { %v2504_v6 = vpop.eup %2503 }
0x124c   : > { %v1947_v9 = vmul.f32 %v2504_v6, %v1939_v62 }
0x124e   : > { %v1952_v11 = vmul.f32 %v2168_v8, %v1947_v9 }
0x1250   : > { %v1957_v12 = vadd.f32 %v2169_v10, %v1952_v11 }
0x1252   : > { %1958 = vst.msk [vmem:[%s444_s27] sm:$0xff] %vm482_vm1, %v1957_v12 }
0x1253   : > { %2518 = shalt.err (!%p2515_p3)
}
0x1254   : > { %s2519_s0 = scalar_lea.hbm %s3013_s1, 128  ;;  %s2523_s15 = scalar_lea.hbm %s3069_s13, 256 }
0x1255   : > { %p2520_p4 = scmp.ne.s32.totalorder %s3013_s1, %s2519_s0  ;;  %p2524_p9 = scmp.lt.u32.totalorder %s3013_s1, %s3069_s13 }
0x1256   : > { %p2525_p10 = scmp.lt.u32.totalorder %s2523_s15, %s2519_s0  ;;  %p2527_p12 = scmp.lt.u32.totalorder %s2519_s0, %s3013_s1 }
0x1257   : > { %p2521_p7 = pnand %p2520_p4, %p2683_p5 }
0x1258   : > { %p2526_p11 = por %p2525_p10, %p2524_p9 }
0x1259   : > { %p2522_p8 = pneg %p2521_p7 }
0x125a   : > { %p2528_p13 = por %p2527_p12, %p2526_p11 }
0x125c   : > { %p2529_p0 = pnand %p2528_p13, %p2522_p8 }
0x125e   : > { %2532 = shalt.err (!%p2529_p0)
}
0x125f   : > { %2409 = dma.vmem_to_hbm [thread:$0]  (%p2683_p5), %s3015_s17, 128, %s3013_s1, %s1960_s21  }
0x1260 PF: > { %p2415_p1 = scmp.ge.s32.totalorder %s2567_s28, 2  ;;  %s1985_s22 = sand.u32 1, %s2555_s25  }
0x1261   : > { %s1986_s29 = scalar_lea.sflag [#allocation4], %s1985_s22 }
0x1262   : > { %p2412_p2 = pnand %p2415_p1, %p2687_p6 }
0x1264   : > { %2550 = dma.done.wait (!%p2412_p2), %s1986_s29, 128  }
0x1265   : > { %2552 = vsyncadd (!%p2412_p2), %s1986_s29, 4294967168  ;;  %s3079_s20 = sld [smem:[#allocation6_spill]]  ;;  %s3080_s27 = sld [smem:[#allocation7_spill]] }
0x1266   : > { %p23_p3 = scmp.ge.s32.totalorder %s2670_s14, 4   ;;  %s3081_s25 = smov %s2559_s26 }
0x1267   : > { %s3083_s28 = smov %s2670_s14 }
0x1268   :  { %25 = sbr.rel (!%p23_p3) target bundleno = 6 (0x6), region = 128 }
0x126b   : > { %s3082_s26 = smov %s3079_s20 }
0x126f   :  { %1991 = vsyncpa [#allocation4], 1 }
0x1270   :  { %1993 = vsyncpa [#allocation4 + $0x1], 1 }

</bundles_post_ra>
